<compile_context>
chip_gen: v6e
topology: v6e:2x2x1
jax: 0.10.0
libtpu: 0.0.40
codegen_flags: <defaults>
</compile_context>

<pallas_src>
import functools

import jax
import jax.numpy as jnp
from jax import lax
from jax.experimental import pallas as pl
from jax.experimental.pallas import tpu as pltpu

EPS = 1e-5


def _round_up(x, m):
    return (x + m - 1) // m * m


def _bn_relu_conv_kernel(x_ref, mask_ref, scale_ref, shift_ref, w_ref, bias_ref,
                         o_ref, *, wp, lout, offmax):
    """Fused BN-affine + ReLU + 3x3 conv for one image.

    x_ref    : (1, Cin, EXT)  raw activations, zero-padded spatially, flattened, placed
                              at lane offset `offmax` (f32)
    mask_ref : (1, EXT)       1.0 at real (interior) pixels, 0.0 at padding / margins
    scale_ref: (Cin, 1)       BN scale = gamma / sqrt(var + eps)  (f32)
    shift_ref: (Cin, 1)       BN shift = beta - mean * scale      (f32)
    w_ref    : (9, Cout, Cin) conv weights, tap-major, transposed (bf16)
    bias_ref : (Cout, 1)      conv bias (f32)
    o_ref    : (1, Cout, Lp)  conv output on the zero-padded flat grid (f32)
    """
    x = x_ref[0]                                                    # (Cin, EXT)
    # BatchNorm affine + ReLU in f32 on the VPU; exact zeros at padding via the mask.
    a = jnp.maximum(x * scale_ref[...] + shift_ref[...], 0.0) * mask_ref[...]
    a = a.astype(jnp.bfloat16)                                      # MXU operand dtype
    cout = w_ref.shape[1]
    acc = jnp.zeros((cout, lout), jnp.float32)
    # In-VMEM im2col: 9 statically lane-shifted views, 9 accumulating MXU matmuls.
    for t in range(9):
        dh, dw = t // 3 - 1, t % 3 - 1
        start = offmax + dh * wp + dw                               # static, always >= 0
        a_t = a[:, start:start + lout]                              # (Cin, Lp)
        acc = acc + jnp.dot(w_ref[t], a_t, preferred_element_type=jnp.float32)
    o_ref[0] = (acc + bias_ref[...]).astype(o_ref.dtype)


def bn_relu_conv3x3(x_flat, gamma, beta, w_oihw, b, H, W):
    """One conv_block: BatchNorm2d (train-mode batch stats) -> ReLU -> Conv2d(3x3, pad=1).

    x_flat: (N, Cin, H*W) f32 activations (NCHW with spatial flattened).
    Returns (N, Cout, H*W) f32.
    """
    N, Cin, HW = x_flat.shape
    assert HW == H * W
    Cout = w_oihw.shape[0]
    Hp, Wp = H + 2, W + 2
    Lp = Hp * Wp                          # flat length of the zero-padded image
    offmax = Wp + 1                       # largest |tap offset| in flat coordinates
    EXT = _round_up(Lp + 2 * offmax, 128)  # lane-aligned input width (margins both sides)

    # --- BatchNorm batch statistics (training mode; biased variance, like PyTorch) ---
    # TODO(synk): the cross-image mean/var reduction stays in plain JAX; fusing it would
    # need a two-pass / cross-grid-step reduction kernel.
    mean = jnp.mean(x_flat, axis=(0, 2))
    var = jnp.var(x_flat, axis=(0, 2))
    scale = gamma * lax.rsqrt(var + EPS)                  # (Cin,)
    shift = beta - mean * scale                           # (Cin,)

    # --- zero-pad spatially, flatten, and place at lane offset `offmax` ---
    xpad = jnp.pad(x_flat.reshape(N, Cin, H, W), ((0, 0), (0, 0), (1, 1), (1, 1)))
    x_ext = jnp.pad(xpad.reshape(N, Cin, Lp),
                    ((0, 0), (0, 0), (offmax, EXT - Lp - offmax)))
    # 0/1 mask of real pixels on the same padded flat grid (true zeros at the border).
    mask = jnp.zeros((Hp, Wp), jnp.float32).at[1:H + 1, 1:W + 1].set(1.0)
    mask_ext = jnp.pad(mask.reshape(1, Lp), ((0, 0), (offmax, EXT - Lp - offmax)))

    # PyTorch conv weight (O, I, kh, kw) -> (tap = kh*3+kw, O, I); bf16 for the MXU.
    w_taps = jnp.transpose(w_oihw, (2, 3, 0, 1)).reshape(9, Cout, Cin).astype(jnp.bfloat16)

    kernel = functools.partial(_bn_relu_conv_kernel, wp=Wp, lout=Lp, offmax=offmax)
    out = pl.pallas_call(
        kernel,
        out_shape=jax.ShapeDtypeStruct((N, Cout, Lp), jnp.float32),
        grid_spec=pltpu.PrefetchScalarGridSpec(
            num_scalar_prefetch=0,
            # One image per grid step (flat-spatial tile of 324+ lanes).  For large H*W,
            # tile the flat-spatial axis (with an `offmax` halo) as a second grid dim.
            grid=(N,),
            in_specs=[
                pl.BlockSpec((1, Cin, EXT), lambda n: (n, 0, 0)),
                pl.BlockSpec((1, EXT), lambda n: (0, 0)),
                pl.BlockSpec((Cin, 1), lambda n: (0, 0)),
                pl.BlockSpec((Cin, 1), lambda n: (0, 0)),
                pl.BlockSpec((9, Cout, Cin), lambda n: (0, 0, 0)),
                pl.BlockSpec((Cout, 1), lambda n: (0, 0)),
            ],
            out_specs=pl.BlockSpec((1, Cout, Lp), lambda n: (n, 0, 0)),
        ),
        compiler_params=pltpu.CompilerParams(
            # Batch axis is embarrassingly parallel -> split across TensorCores on v7x.
            dimension_semantics=("parallel",),
            # Explicit VMEM budget, safe on v5e/v6e/v7x (blocks here are ~100 KiB;
            # re-derive for larger shapes / 64 MiB v7x VMEM).
            vmem_limit_bytes=32 * 1024 * 1024,
        ),
    )(x_ext, mask_ext, scale.reshape(Cin, 1), shift.reshape(Cin, 1),
      w_taps, b.reshape(Cout, 1))

    # Drop the padded border: (N, Cout, Lp) -> interior (N, Cout, H, W) -> flat HW.
    y = out.reshape(N, Cout, Hp, Wp)[:, :, 1:H + 1, 1:W + 1]
    return y.reshape(N, Cout, HW)


def dense_block_forward(x_nchw, params):
    """DenseBlock.forward: X = cat(X, layer(X), dim=1) for each conv_block."""
    N, C0, H, W = x_nchw.shape
    growth = params[0][2].shape[0]
    C_total = C0 + len(params) * growth
    HW = H * W
    # Preallocate the whole dense feature map once; each layer writes its channel slice
    # in place (no per-layer full-feature concatenate copy).
    feat = jnp.zeros((N, C_total, HW), jnp.float32)
    feat = feat.at[:, :C0, :].set(x_nchw.reshape(N, C0, HW))
    c = C0
    for (gamma, beta, w, b) in params:
        y = bn_relu_conv3x3(feat[:, :c, :], gamma, beta, w, b, H, W)
        feat = feat.at[:, c:c + growth, :].set(y)
        c += growth
    return feat.reshape(N, C_total, H, W)


def init_params(key, in_channels, out_channels, num_conv):
    params = []
    for i in range(num_conv):
        in_c = in_channels + i * out_channels
        key, kw, kb = jax.random.split(key, 3)
        gamma = jnp.ones((in_c,), jnp.float32)        # BatchNorm2d default init
        beta = jnp.zeros((in_c,), jnp.float32)
        w = 0.05 * jax.random.normal(kw, (out_channels, in_c, 3, 3), jnp.float32)
        b = 0.05 * jax.random.normal(kb, (out_channels,), jnp.float32)
        params.append((gamma, beta, w, b))
    return params


def reference_forward(x_nchw, params, matmul_dtype=jnp.float32):
    # Pure-JAX (XLA conv) reference.  matmul_dtype=bfloat16 mirrors the kernel's MXU
    # operand quantization (f32 accumulation either way).
    x = x_nchw
    for (gamma, beta, w, b) in params:
        mean = jnp.mean(x, axis=(0, 2, 3))
        var = jnp.var(x, axis=(0, 2, 3))
        scale = gamma * lax.rsqrt(var + EPS)
        shift = beta - mean * scale
        a = jnp.maximum(x * scale[None, :, None, None] + shift[None, :, None, None], 0.0)
        y = lax.conv_general_dilated(
            a.astype(matmul_dtype), w.astype(matmul_dtype), (1, 1), 'SAME',
            dimension_numbers=('NCHW', 'OIHW', 'NCHW'),
            preferred_element_type=jnp.float32) + b[None, :, None, None]
        x = jnp.concatenate([x, y], axis=1)
    return x


if __name__ == "__main__":
    key = jax.random.PRNGKey(0)
    in_channels, growth, num_conv = 4, 8, 3
    N, H, W = 2, 16, 16
    key, kx = jax.random.split(key)
    x = jax.random.normal(kx, (N, in_channels, H, W), jnp.float32)  # NCHW, like PyTorch
    params = init_params(key, in_channels, growth, num_conv)

    fwd = jax.jit(dense_block_forward)
    out = jax.block_until_ready(fwd(x, params))
    assert out.shape == (N, in_channels + num_conv * growth, H, W)

    # Tight check vs. a reference that quantizes conv operands to bf16 exactly like the
    # kernel does (isolates kernel/plumbing correctness from the intended precision trade).
    ref_bf16 = reference_forward(x, params, jnp.bfloat16)
    err_bf16 = float(jnp.max(jnp.abs(out - ref_bf16)))
    assert err_bf16 < 5e-3, f"max abs error vs bf16-matmul reference: {err_bf16}"

    # Looser check vs. the full-f32 reference (bf16 MXU operands cost ~1e-3 abs here).
    ref_f32 = reference_forward(x, params, jnp.float32)
    err_f32 = float(jnp.max(jnp.abs(out - ref_f32)))
    assert err_f32 < 2e-2, f"max abs error vs f32 reference: {err_f32}"

    print("KERNEL_OK")
</pallas_src>

<mosaic_0001>
module attributes {stable_mosaic.version = 11 : i64} {
  func.func @_bn_relu_conv_kernel(%arg0: i32, %arg1: memref<1x4x384xf32, #tpu.memory_space<vmem>>, %arg2: memref<1x384xf32, #tpu.memory_space<vmem>>, %arg3: memref<4x1xf32, #tpu.memory_space<vmem>>, %arg4: memref<4x1xf32, #tpu.memory_space<vmem>>, %arg5: memref<9x8x4xbf16, #tpu.memory_space<vmem>>, %arg6: memref<8x1xf32, #tpu.memory_space<vmem>>, %arg7: memref<1x8x324xf32, #tpu.memory_space<vmem>>) attributes {dimension_semantics = [#tpu.dimension_semantics<parallel>], iteration_bounds = array<i64: 2>, scalar_prefetch = 0 : i64, scratch_operands = 0 : i64, tpu.core_type = #tpu.core_type<tc>, window_params = [{transform_indices = @transform_0, window_bounds = array<i64: 1, 4, 384>}, {pipeline_mode = #tpu.pipeline_mode<synchronous>, transform_indices = @transform_1, window_bounds = array<i64: 1, 384>}, {pipeline_mode = #tpu.pipeline_mode<synchronous>, transform_indices = @transform_2, window_bounds = array<i64: 4, 1>}, {pipeline_mode = #tpu.pipeline_mode<synchronous>, transform_indices = @transform_3, window_bounds = array<i64: 4, 1>}, {pipeline_mode = #tpu.pipeline_mode<synchronous>, transform_indices = @transform_4, window_bounds = array<i64: 9, 8, 4>}, {pipeline_mode = #tpu.pipeline_mode<synchronous>, transform_indices = @transform_5, window_bounds = array<i64: 8, 1>}, {transform_indices = @transform_6, window_bounds = array<i64: 1, 8, 324>}]} {
    %c0 = arith.constant 0 : index
    %c0_0 = arith.constant 0 : index
    %c0_1 = arith.constant 0 : index
    %0 = vector.load %arg1[%c0, %c0_0, %c0_1] : memref<1x4x384xf32, #tpu.memory_space<vmem>>, vector<1x4x384xf32>
    %1 = vector.shape_cast %0 : vector<1x4x384xf32> to vector<4x384xf32>
    %c0_2 = arith.constant 0 : index
    %c0_3 = arith.constant 0 : index
    %2 = vector.load %arg3[%c0_2, %c0_3] : memref<4x1xf32, #tpu.memory_space<vmem>>, vector<4x1xf32>
    %3 = vector.broadcast %2 : vector<4x1xf32> to vector<4x384xf32>
    %4 = arith.mulf %1, %3 : vector<4x384xf32>
    %c0_4 = arith.constant 0 : index
    %c0_5 = arith.constant 0 : index
    %5 = vector.load %arg4[%c0_4, %c0_5] : memref<4x1xf32, #tpu.memory_space<vmem>>, vector<4x1xf32>
    %6 = vector.broadcast %5 : vector<4x1xf32> to vector<4x384xf32>
    %7 = arith.addf %4, %6 : vector<4x384xf32>
    %cst = arith.constant 0.000000e+00 : f32
    %8 = vector.broadcast %cst : f32 to vector<4x384xf32>
    %9 = arith.maximumf %7, %8 : vector<4x384xf32>
    %c0_6 = arith.constant 0 : index
    %c0_7 = arith.constant 0 : index
    %10 = vector.load %arg2[%c0_6, %c0_7] : memref<1x384xf32, #tpu.memory_space<vmem>>, vector<1x384xf32>
    %11 = vector.broadcast %10 : vector<1x384xf32> to vector<4x384xf32>
    %12 = arith.mulf %9, %11 : vector<4x384xf32>
    %13 = arith.truncf %12 : vector<4x384xf32> to vector<4x384xbf16>
    %cst_8 = arith.constant 0.000000e+00 : f32
    %14 = vector.broadcast %cst_8 : f32 to vector<8x324xf32>
    %15 = vector.extract_strided_slice %13 {offsets = [0, 0], sizes = [4, 324], strides = [1, 1]} : vector<4x384xbf16> to vector<4x324xbf16>
    %c0_9 = arith.constant 0 : index
    %c0_10 = arith.constant 0 : index
    %c0_11 = arith.constant 0 : index
    %16 = vector.load %arg5[%c0_9, %c0_10, %c0_11] : memref<9x8x4xbf16, #tpu.memory_space<vmem>>, vector<1x8x4xbf16>
    %17 = vector.shape_cast %16 : vector<1x8x4xbf16> to vector<8x4xbf16>
    %cst_12 = arith.constant dense<0.000000e+00> : vector<8x324xf32>
    %18 = tpu.matmul %17, %15, %cst_12 {dimension_numbers = #tpu.dot_dimension_numbers<[1], [0], [0], [1], [0, 0, 1, 1], [], []>} : vector<8x4xbf16>, vector<4x324xbf16>, vector<8x324xf32> -> vector<8x324xf32>
    %19 = arith.addf %14, %18 : vector<8x324xf32>
    %20 = vector.extract_strided_slice %13 {offsets = [0, 1], sizes = [4, 324], strides = [1, 1]} : vector<4x384xbf16> to vector<4x324xbf16>
    %c1 = arith.constant 1 : index
    %c0_13 = arith.constant 0 : index
    %c0_14 = arith.constant 0 : index
    %21 = vector.load %arg5[%c1, %c0_13, %c0_14] : memref<9x8x4xbf16, #tpu.memory_space<vmem>>, vector<1x8x4xbf16>
    %22 = vector.shape_cast %21 : vector<1x8x4xbf16> to vector<8x4xbf16>
    %cst_15 = arith.constant dense<0.000000e+00> : vector<8x324xf32>
    %23 = tpu.matmul %22, %20, %cst_15 {dimension_numbers = #tpu.dot_dimension_numbers<[1], [0], [0], [1], [0, 0, 1, 1], [], []>} : vector<8x4xbf16>, vector<4x324xbf16>, vector<8x324xf32> -> vector<8x324xf32>
    %24 = arith.addf %19, %23 : vector<8x324xf32>
    %25 = vector.extract_strided_slice %13 {offsets = [0, 2], sizes = [4, 324], strides = [1, 1]} : vector<4x384xbf16> to vector<4x324xbf16>
    %c2 = arith.constant 2 : index
    %c0_16 = arith.constant 0 : index
    %c0_17 = arith.constant 0 : index
    %26 = vector.load %arg5[%c2, %c0_16, %c0_17] : memref<9x8x4xbf16, #tpu.memory_space<vmem>>, vector<1x8x4xbf16>
    %27 = vector.shape_cast %26 : vector<1x8x4xbf16> to vector<8x4xbf16>
    %cst_18 = arith.constant dense<0.000000e+00> : vector<8x324xf32>
    %28 = tpu.matmul %27, %25, %cst_18 {dimension_numbers = #tpu.dot_dimension_numbers<[1], [0], [0], [1], [0, 0, 1, 1], [], []>} : vector<8x4xbf16>, vector<4x324xbf16>, vector<8x324xf32> -> vector<8x324xf32>
    %29 = arith.addf %24, %28 : vector<8x324xf32>
    %30 = vector.extract_strided_slice %13 {offsets = [0, 18], sizes = [4, 324], strides = [1, 1]} : vector<4x384xbf16> to vector<4x324xbf16>
    %c3 = arith.constant 3 : index
    %c0_19 = arith.constant 0 : index
    %c0_20 = arith.constant 0 : index
    %31 = vector.load %arg5[%c3, %c0_19, %c0_20] : memref<9x8x4xbf16, #tpu.memory_space<vmem>>, vector<1x8x4xbf16>
    %32 = vector.shape_cast %31 : vector<1x8x4xbf16> to vector<8x4xbf16>
    %cst_21 = arith.constant dense<0.000000e+00> : vector<8x324xf32>
    %33 = tpu.matmul %32, %30, %cst_21 {dimension_numbers = #tpu.dot_dimension_numbers<[1], [0], [0], [1], [0, 0, 1, 1], [], []>} : vector<8x4xbf16>, vector<4x324xbf16>, vector<8x324xf32> -> vector<8x324xf32>
    %34 = arith.addf %29, %33 : vector<8x324xf32>
    %35 = vector.extract_strided_slice %13 {offsets = [0, 19], sizes = [4, 324], strides = [1, 1]} : vector<4x384xbf16> to vector<4x324xbf16>
    %c4 = arith.constant 4 : index
    %c0_22 = arith.constant 0 : index
    %c0_23 = arith.constant 0 : index
    %36 = vector.load %arg5[%c4, %c0_22, %c0_23] : memref<9x8x4xbf16, #tpu.memory_space<vmem>>, vector<1x8x4xbf16>
    %37 = vector.shape_cast %36 : vector<1x8x4xbf16> to vector<8x4xbf16>
    %cst_24 = arith.constant dense<0.000000e+00> : vector<8x324xf32>
    %38 = tpu.matmul %37, %35, %cst_24 {dimension_numbers = #tpu.dot_dimension_numbers<[1], [0], [0], [1], [0, 0, 1, 1], [], []>} : vector<8x4xbf16>, vector<4x324xbf16>, vector<8x324xf32> -> vector<8x324xf32>
    %39 = arith.addf %34, %38 : vector<8x324xf32>
    %40 = vector.extract_strided_slice %13 {offsets = [0, 20], sizes = [4, 324], strides = [1, 1]} : vector<4x384xbf16> to vector<4x324xbf16>
    %c5 = arith.constant 5 : index
    %c0_25 = arith.constant 0 : index
    %c0_26 = arith.constant 0 : index
    %41 = vector.load %arg5[%c5, %c0_25, %c0_26] : memref<9x8x4xbf16, #tpu.memory_space<vmem>>, vector<1x8x4xbf16>
    %42 = vector.shape_cast %41 : vector<1x8x4xbf16> to vector<8x4xbf16>
    %cst_27 = arith.constant dense<0.000000e+00> : vector<8x324xf32>
    %43 = tpu.matmul %42, %40, %cst_27 {dimension_numbers = #tpu.dot_dimension_numbers<[1], [0], [0], [1], [0, 0, 1, 1], [], []>} : vector<8x4xbf16>, vector<4x324xbf16>, vector<8x324xf32> -> vector<8x324xf32>
    %44 = arith.addf %39, %43 : vector<8x324xf32>
    %45 = vector.extract_strided_slice %13 {offsets = [0, 36], sizes = [4, 324], strides = [1, 1]} : vector<4x384xbf16> to vector<4x324xbf16>
    %c6 = arith.constant 6 : index
    %c0_28 = arith.constant 0 : index
    %c0_29 = arith.constant 0 : index
    %46 = vector.load %arg5[%c6, %c0_28, %c0_29] : memref<9x8x4xbf16, #tpu.memory_space<vmem>>, vector<1x8x4xbf16>
    %47 = vector.shape_cast %46 : vector<1x8x4xbf16> to vector<8x4xbf16>
    %cst_30 = arith.constant dense<0.000000e+00> : vector<8x324xf32>
    %48 = tpu.matmul %47, %45, %cst_30 {dimension_numbers = #tpu.dot_dimension_numbers<[1], [0], [0], [1], [0, 0, 1, 1], [], []>} : vector<8x4xbf16>, vector<4x324xbf16>, vector<8x324xf32> -> vector<8x324xf32>
    %49 = arith.addf %44, %48 : vector<8x324xf32>
    %50 = vector.extract_strided_slice %13 {offsets = [0, 37], sizes = [4, 324], strides = [1, 1]} : vector<4x384xbf16> to vector<4x324xbf16>
    %c7 = arith.constant 7 : index
    %c0_31 = arith.constant 0 : index
    %c0_32 = arith.constant 0 : index
    %51 = vector.load %arg5[%c7, %c0_31, %c0_32] : memref<9x8x4xbf16, #tpu.memory_space<vmem>>, vector<1x8x4xbf16>
    %52 = vector.shape_cast %51 : vector<1x8x4xbf16> to vector<8x4xbf16>
    %cst_33 = arith.constant dense<0.000000e+00> : vector<8x324xf32>
    %53 = tpu.matmul %52, %50, %cst_33 {dimension_numbers = #tpu.dot_dimension_numbers<[1], [0], [0], [1], [0, 0, 1, 1], [], []>} : vector<8x4xbf16>, vector<4x324xbf16>, vector<8x324xf32> -> vector<8x324xf32>
    %54 = arith.addf %49, %53 : vector<8x324xf32>
    %55 = vector.extract_strided_slice %13 {offsets = [0, 38], sizes = [4, 324], strides = [1, 1]} : vector<4x384xbf16> to vector<4x324xbf16>
    %c8 = arith.constant 8 : index
    %c0_34 = arith.constant 0 : index
    %c0_35 = arith.constant 0 : index
    %56 = vector.load %arg5[%c8, %c0_34, %c0_35] : memref<9x8x4xbf16, #tpu.memory_space<vmem>>, vector<1x8x4xbf16>
    %57 = vector.shape_cast %56 : vector<1x8x4xbf16> to vector<8x4xbf16>
    %cst_36 = arith.constant dense<0.000000e+00> : vector<8x324xf32>
    %58 = tpu.matmul %57, %55, %cst_36 {dimension_numbers = #tpu.dot_dimension_numbers<[1], [0], [0], [1], [0, 0, 1, 1], [], []>} : vector<8x4xbf16>, vector<4x324xbf16>, vector<8x324xf32> -> vector<8x324xf32>
    %59 = arith.addf %54, %58 : vector<8x324xf32>
    %c0_37 = arith.constant 0 : index
    %c0_38 = arith.constant 0 : index
    %60 = vector.load %arg6[%c0_37, %c0_38] : memref<8x1xf32, #tpu.memory_space<vmem>>, vector<8x1xf32>
    %61 = vector.broadcast %60 : vector<8x1xf32> to vector<8x324xf32>
    %62 = arith.addf %59, %61 : vector<8x324xf32>
    %c0_39 = arith.constant 0 : index
    %c0_40 = arith.constant 0 : index
    %c0_41 = arith.constant 0 : index
    %63 = vector.load %arg7[%c0_39, %c0_40, %c0_41] : memref<1x8x324xf32, #tpu.memory_space<vmem>>, vector<1x8x324xf32>
    %64 = vector.shape_cast %63 : vector<1x8x324xf32> to vector<8x324xf32>
    %65 = vector.shape_cast %62 : vector<8x324xf32> to vector<1x8x324xf32>
    tpu.vector_store %arg7[%c0_39, %c0_40, %c0_41], %65 {strides = array<i32>} : memref<1x8x324xf32, #tpu.memory_space<vmem>>, vector<1x8x324xf32>,
    return
  }
  func.func @transform_0(%arg0: i32) -> (i32, i32, i32) {
    %c0_i32 = arith.constant 0 : i32
    %c0_i32_0 = arith.constant 0 : i32
    %c0_i32_1 = arith.constant 0 : i32
    return %arg0, %c0_i32, %c0_i32_0 : i32, i32, i32
  }
  func.func @transform_1(%arg0: i32) -> (i32, i32) {
    %c0_i32 = arith.constant 0 : i32
    %c0_i32_0 = arith.constant 0 : i32
    %c0_i32_1 = arith.constant 0 : i32
    return %c0_i32, %c0_i32_0 : i32, i32
  }
  func.func @transform_2(%arg0: i32) -> (i32, i32) {
    %c0_i32 = arith.constant 0 : i32
    %c0_i32_0 = arith.constant 0 : i32
    %c0_i32_1 = arith.constant 0 : i32
    return %c0_i32, %c0_i32_0 : i32, i32
  }
  func.func @transform_3(%arg0: i32) -> (i32, i32) {
    %c0_i32 = arith.constant 0 : i32
    %c0_i32_0 = arith.constant 0 : i32
    %c0_i32_1 = arith.constant 0 : i32
    return %c0_i32, %c0_i32_0 : i32, i32
  }
  func.func @transform_4(%arg0: i32) -> (i32, i32, i32) {
    %c0_i32 = arith.constant 0 : i32
    %c0_i32_0 = arith.constant 0 : i32
    %c0_i32_1 = arith.constant 0 : i32
    %c0_i32_2 = arith.constant 0 : i32
    return %c0_i32, %c0_i32_0, %c0_i32_1 : i32, i32, i32
  }
  func.func @transform_5(%arg0: i32) -> (i32, i32) {
    %c0_i32 = arith.constant 0 : i32
    %c0_i32_0 = arith.constant 0 : i32
    %c0_i32_1 = arith.constant 0 : i32
    return %c0_i32, %c0_i32_0 : i32, i32
  }
  func.func @transform_6(%arg0: i32) -> (i32, i32, i32) {
    %c0_i32 = arith.constant 0 : i32
    %c0_i32_0 = arith.constant 0 : i32
    %c0_i32_1 = arith.constant 0 : i32
    return %arg0, %c0_i32, %c0_i32_0 : i32, i32, i32
  }
}

module attributes {stable_mosaic.version = 11 : i64} {
  func.func @_bn_relu_conv_kernel(%arg0: i32, %arg1: memref<1x12x384xf32, #tpu.memory_space<vmem>>, %arg2: memref<1x384xf32, #tpu.memory_space<vmem>>, %arg3: memref<12x1xf32, #tpu.memory_space<vmem>>, %arg4: memref<12x1xf32, #tpu.memory_space<vmem>>, %arg5: memref<9x8x12xbf16, #tpu.memory_space<vmem>>, %arg6: memref<8x1xf32, #tpu.memory_space<vmem>>, %arg7: memref<1x8x324xf32, #tpu.memory_space<vmem>>) attributes {dimension_semantics = [#tpu.dimension_semantics<parallel>], iteration_bounds = array<i64: 2>, scalar_prefetch = 0 : i64, scratch_operands = 0 : i64, tpu.core_type = #tpu.core_type<tc>, window_params = [{transform_indices = @transform_0, window_bounds = array<i64: 1, 12, 384>}, {pipeline_mode = #tpu.pipeline_mode<synchronous>, transform_indices = @transform_1, window_bounds = array<i64: 1, 384>}, {pipeline_mode = #tpu.pipeline_mode<synchronous>, transform_indices = @transform_2, window_bounds = array<i64: 12, 1>}, {pipeline_mode = #tpu.pipeline_mode<synchronous>, transform_indices = @transform_3, window_bounds = array<i64: 12, 1>}, {pipeline_mode = #tpu.pipeline_mode<synchronous>, transform_indices = @transform_4, window_bounds = array<i64: 9, 8, 12>}, {pipeline_mode = #tpu.pipeline_mode<synchronous>, transform_indices = @transform_5, window_bounds = array<i64: 8, 1>}, {transform_indices = @transform_6, window_bounds = array<i64: 1, 8, 324>}]} {
    %c0 = arith.constant 0 : index
    %c0_0 = arith.constant 0 : index
    %c0_1 = arith.constant 0 : index
    %0 = vector.load %arg1[%c0, %c0_0, %c0_1] : memref<1x12x384xf32, #tpu.memory_space<vmem>>, vector<1x12x384xf32>
    %1 = vector.shape_cast %0 : vector<1x12x384xf32> to vector<12x384xf32>
    %c0_2 = arith.constant 0 : index
    %c0_3 = arith.constant 0 : index
    %2 = vector.load %arg3[%c0_2, %c0_3] : memref<12x1xf32, #tpu.memory_space<vmem>>, vector<12x1xf32>
    %3 = vector.broadcast %2 : vector<12x1xf32> to vector<12x384xf32>
    %4 = arith.mulf %1, %3 : vector<12x384xf32>
    %c0_4 = arith.constant 0 : index
    %c0_5 = arith.constant 0 : index
    %5 = vector.load %arg4[%c0_4, %c0_5] : memref<12x1xf32, #tpu.memory_space<vmem>>, vector<12x1xf32>
    %6 = vector.broadcast %5 : vector<12x1xf32> to vector<12x384xf32>
    %7 = arith.addf %4, %6 : vector<12x384xf32>
    %cst = arith.constant 0.000000e+00 : f32
    %8 = vector.broadcast %cst : f32 to vector<12x384xf32>
    %9 = arith.maximumf %7, %8 : vector<12x384xf32>
    %c0_6 = arith.constant 0 : index
    %c0_7 = arith.constant 0 : index
    %10 = vector.load %arg2[%c0_6, %c0_7] : memref<1x384xf32, #tpu.memory_space<vmem>>, vector<1x384xf32>
    %11 = vector.broadcast %10 : vector<1x384xf32> to vector<12x384xf32>
    %12 = arith.mulf %9, %11 : vector<12x384xf32>
    %13 = arith.truncf %12 : vector<12x384xf32> to vector<12x384xbf16>
    %cst_8 = arith.constant 0.000000e+00 : f32
    %14 = vector.broadcast %cst_8 : f32 to vector<8x324xf32>
    %15 = vector.extract_strided_slice %13 {offsets = [0, 0], sizes = [12, 324], strides = [1, 1]} : vector<12x384xbf16> to vector<12x324xbf16>
    %c0_9 = arith.constant 0 : index
    %c0_10 = arith.constant 0 : index
    %c0_11 = arith.constant 0 : index
    %16 = vector.load %arg5[%c0_9, %c0_10, %c0_11] : memref<9x8x12xbf16, #tpu.memory_space<vmem>>, vector<1x8x12xbf16>
    %17 = vector.shape_cast %16 : vector<1x8x12xbf16> to vector<8x12xbf16>
    %cst_12 = arith.constant dense<0.000000e+00> : vector<8x324xf32>
    %18 = tpu.matmul %17, %15, %cst_12 {dimension_numbers = #tpu.dot_dimension_numbers<[1], [0], [0], [1], [0, 0, 1, 1], [], []>} : vector<8x12xbf16>, vector<12x324xbf16>, vector<8x324xf32> -> vector<8x324xf32>
    %19 = arith.addf %14, %18 : vector<8x324xf32>
    %20 = vector.extract_strided_slice %13 {offsets = [0, 1], sizes = [12, 324], strides = [1, 1]} : vector<12x384xbf16> to vector<12x324xbf16>
    %c1 = arith.constant 1 : index
    %c0_13 = arith.constant 0 : index
    %c0_14 = arith.constant 0 : index
    %21 = vector.load %arg5[%c1, %c0_13, %c0_14] : memref<9x8x12xbf16, #tpu.memory_space<vmem>>, vector<1x8x12xbf16>
    %22 = vector.shape_cast %21 : vector<1x8x12xbf16> to vector<8x12xbf16>
    %cst_15 = arith.constant dense<0.000000e+00> : vector<8x324xf32>
    %23 = tpu.matmul %22, %20, %cst_15 {dimension_numbers = #tpu.dot_dimension_numbers<[1], [0], [0], [1], [0, 0, 1, 1], [], []>} : vector<8x12xbf16>, vector<12x324xbf16>, vector<8x324xf32> -> vector<8x324xf32>
    %24 = arith.addf %19, %23 : vector<8x324xf32>
    %25 = vector.extract_strided_slice %13 {offsets = [0, 2], sizes = [12, 324], strides = [1, 1]} : vector<12x384xbf16> to vector<12x324xbf16>
    %c2 = arith.constant 2 : index
    %c0_16 = arith.constant 0 : index
    %c0_17 = arith.constant 0 : index
    %26 = vector.load %arg5[%c2, %c0_16, %c0_17] : memref<9x8x12xbf16, #tpu.memory_space<vmem>>, vector<1x8x12xbf16>
    %27 = vector.shape_cast %26 : vector<1x8x12xbf16> to vector<8x12xbf16>
    %cst_18 = arith.constant dense<0.000000e+00> : vector<8x324xf32>
    %28 = tpu.matmul %27, %25, %cst_18 {dimension_numbers = #tpu.dot_dimension_numbers<[1], [0], [0], [1], [0, 0, 1, 1], [], []>} : vector<8x12xbf16>, vector<12x324xbf16>, vector<8x324xf32> -> vector<8x324xf32>
    %29 = arith.addf %24, %28 : vector<8x324xf32>
    %30 = vector.extract_strided_slice %13 {offsets = [0, 18], sizes = [12, 324], strides = [1, 1]} : vector<12x384xbf16> to vector<12x324xbf16>
    %c3 = arith.constant 3 : index
    %c0_19 = arith.constant 0 : index
    %c0_20 = arith.constant 0 : index
    %31 = vector.load %arg5[%c3, %c0_19, %c0_20] : memref<9x8x12xbf16, #tpu.memory_space<vmem>>, vector<1x8x12xbf16>
    %32 = vector.shape_cast %31 : vector<1x8x12xbf16> to vector<8x12xbf16>
    %cst_21 = arith.constant dense<0.000000e+00> : vector<8x324xf32>
    %33 = tpu.matmul %32, %30, %cst_21 {dimension_numbers = #tpu.dot_dimension_numbers<[1], [0], [0], [1], [0, 0, 1, 1], [], []>} : vector<8x12xbf16>, vector<12x324xbf16>, vector<8x324xf32> -> vector<8x324xf32>
    %34 = arith.addf %29, %33 : vector<8x324xf32>
    %35 = vector.extract_strided_slice %13 {offsets = [0, 19], sizes = [12, 324], strides = [1, 1]} : vector<12x384xbf16> to vector<12x324xbf16>
    %c4 = arith.constant 4 : index
    %c0_22 = arith.constant 0 : index
    %c0_23 = arith.constant 0 : index
    %36 = vector.load %arg5[%c4, %c0_22, %c0_23] : memref<9x8x12xbf16, #tpu.memory_space<vmem>>, vector<1x8x12xbf16>
    %37 = vector.shape_cast %36 : vector<1x8x12xbf16> to vector<8x12xbf16>
    %cst_24 = arith.constant dense<0.000000e+00> : vector<8x324xf32>
    %38 = tpu.matmul %37, %35, %cst_24 {dimension_numbers = #tpu.dot_dimension_numbers<[1], [0], [0], [1], [0, 0, 1, 1], [], []>} : vector<8x12xbf16>, vector<12x324xbf16>, vector<8x324xf32> -> vector<8x324xf32>
    %39 = arith.addf %34, %38 : vector<8x324xf32>
    %40 = vector.extract_strided_slice %13 {offsets = [0, 20], sizes = [12, 324], strides = [1, 1]} : vector<12x384xbf16> to vector<12x324xbf16>
    %c5 = arith.constant 5 : index
    %c0_25 = arith.constant 0 : index
    %c0_26 = arith.constant 0 : index
    %41 = vector.load %arg5[%c5, %c0_25, %c0_26] : memref<9x8x12xbf16, #tpu.memory_space<vmem>>, vector<1x8x12xbf16>
    %42 = vector.shape_cast %41 : vector<1x8x12xbf16> to vector<8x12xbf16>
    %cst_27 = arith.constant dense<0.000000e+00> : vector<8x324xf32>
    %43 = tpu.matmul %42, %40, %cst_27 {dimension_numbers = #tpu.dot_dimension_numbers<[1], [0], [0], [1], [0, 0, 1, 1], [], []>} : vector<8x12xbf16>, vector<12x324xbf16>, vector<8x324xf32> -> vector<8x324xf32>
    %44 = arith.addf %39, %43 : vector<8x324xf32>
    %45 = vector.extract_strided_slice %13 {offsets = [0, 36], sizes = [12, 324], strides = [1, 1]} : vector<12x384xbf16> to vector<12x324xbf16>
    %c6 = arith.constant 6 : index
    %c0_28 = arith.constant 0 : index
    %c0_29 = arith.constant 0 : index
    %46 = vector.load %arg5[%c6, %c0_28, %c0_29] : memref<9x8x12xbf16, #tpu.memory_space<vmem>>, vector<1x8x12xbf16>
    %47 = vector.shape_cast %46 : vector<1x8x12xbf16> to vector<8x12xbf16>
    %cst_30 = arith.constant dense<0.000000e+00> : vector<8x324xf32>
    %48 = tpu.matmul %47, %45, %cst_30 {dimension_numbers = #tpu.dot_dimension_numbers<[1], [0], [0], [1], [0, 0, 1, 1], [], []>} : vector<8x12xbf16>, vector<12x324xbf16>, vector<8x324xf32> -> vector<8x324xf32>
    %49 = arith.addf %44, %48 : vector<8x324xf32>
    %50 = vector.extract_strided_slice %13 {offsets = [0, 37], sizes = [12, 324], strides = [1, 1]} : vector<12x384xbf16> to vector<12x324xbf16>
    %c7 = arith.constant 7 : index
    %c0_31 = arith.constant 0 : index
    %c0_32 = arith.constant 0 : index
    %51 = vector.load %arg5[%c7, %c0_31, %c0_32] : memref<9x8x12xbf16, #tpu.memory_space<vmem>>, vector<1x8x12xbf16>
    %52 = vector.shape_cast %51 : vector<1x8x12xbf16> to vector<8x12xbf16>
    %cst_33 = arith.constant dense<0.000000e+00> : vector<8x324xf32>
    %53 = tpu.matmul %52, %50, %cst_33 {dimension_numbers = #tpu.dot_dimension_numbers<[1], [0], [0], [1], [0, 0, 1, 1], [], []>} : vector<8x12xbf16>, vector<12x324xbf16>, vector<8x324xf32> -> vector<8x324xf32>
    %54 = arith.addf %49, %53 : vector<8x324xf32>
    %55 = vector.extract_strided_slice %13 {offsets = [0, 38], sizes = [12, 324], strides = [1, 1]} : vector<12x384xbf16> to vector<12x324xbf16>
    %c8 = arith.constant 8 : index
    %c0_34 = arith.constant 0 : index
    %c0_35 = arith.constant 0 : index
    %56 = vector.load %arg5[%c8, %c0_34, %c0_35] : memref<9x8x12xbf16, #tpu.memory_space<vmem>>, vector<1x8x12xbf16>
    %57 = vector.shape_cast %56 : vector<1x8x12xbf16> to vector<8x12xbf16>
    %cst_36 = arith.constant dense<0.000000e+00> : vector<8x324xf32>
    %58 = tpu.matmul %57, %55, %cst_36 {dimension_numbers = #tpu.dot_dimension_numbers<[1], [0], [0], [1], [0, 0, 1, 1], [], []>} : vector<8x12xbf16>, vector<12x324xbf16>, vector<8x324xf32> -> vector<8x324xf32>
    %59 = arith.addf %54, %58 : vector<8x324xf32>
    %c0_37 = arith.constant 0 : index
    %c0_38 = arith.constant 0 : index
    %60 = vector.load %arg6[%c0_37, %c0_38] : memref<8x1xf32, #tpu.memory_space<vmem>>, vector<8x1xf32>
    %61 = vector.broadcast %60 : vector<8x1xf32> to vector<8x324xf32>
    %62 = arith.addf %59, %61 : vector<8x324xf32>
    %c0_39 = arith.constant 0 : index
    %c0_40 = arith.constant 0 : index
    %c0_41 = arith.constant 0 : index
    %63 = vector.load %arg7[%c0_39, %c0_40, %c0_41] : memref<1x8x324xf32, #tpu.memory_space<vmem>>, vector<1x8x324xf32>
    %64 = vector.shape_cast %63 : vector<1x8x324xf32> to vector<8x324xf32>
    %65 = vector.shape_cast %62 : vector<8x324xf32> to vector<1x8x324xf32>
    tpu.vector_store %arg7[%c0_39, %c0_40, %c0_41], %65 {strides = array<i32>} : memref<1x8x324xf32, #tpu.memory_space<vmem>>, vector<1x8x324xf32>,
    return
  }
  func.func @transform_0(%arg0: i32) -> (i32, i32, i32) {
    %c0_i32 = arith.constant 0 : i32
    %c0_i32_0 = arith.constant 0 : i32
    %c0_i32_1 = arith.constant 0 : i32
    return %arg0, %c0_i32, %c0_i32_0 : i32, i32, i32
  }
  func.func @transform_1(%arg0: i32) -> (i32, i32) {
    %c0_i32 = arith.constant 0 : i32
    %c0_i32_0 = arith.constant 0 : i32
    %c0_i32_1 = arith.constant 0 : i32
    return %c0_i32, %c0_i32_0 : i32, i32
  }
  func.func @transform_2(%arg0: i32) -> (i32, i32) {
    %c0_i32 = arith.constant 0 : i32
    %c0_i32_0 = arith.constant 0 : i32
    %c0_i32_1 = arith.constant 0 : i32
    return %c0_i32, %c0_i32_0 : i32, i32
  }
  func.func @transform_3(%arg0: i32) -> (i32, i32) {
    %c0_i32 = arith.constant 0 : i32
    %c0_i32_0 = arith.constant 0 : i32
    %c0_i32_1 = arith.constant 0 : i32
    return %c0_i32, %c0_i32_0 : i32, i32
  }
  func.func @transform_4(%arg0: i32) -> (i32, i32, i32) {
    %c0_i32 = arith.constant 0 : i32
    %c0_i32_0 = arith.constant 0 : i32
    %c0_i32_1 = arith.constant 0 : i32
    %c0_i32_2 = arith.constant 0 : i32
    return %c0_i32, %c0_i32_0, %c0_i32_1 : i32, i32, i32
  }
  func.func @transform_5(%arg0: i32) -> (i32, i32) {
    %c0_i32 = arith.constant 0 : i32
    %c0_i32_0 = arith.constant 0 : i32
    %c0_i32_1 = arith.constant 0 : i32
    return %c0_i32, %c0_i32_0 : i32, i32
  }
  func.func @transform_6(%arg0: i32) -> (i32, i32, i32) {
    %c0_i32 = arith.constant 0 : i32
    %c0_i32_0 = arith.constant 0 : i32
    %c0_i32_1 = arith.constant 0 : i32
    return %arg0, %c0_i32, %c0_i32_0 : i32, i32, i32
  }
}

module attributes {stable_mosaic.version = 11 : i64} {
  func.func @_bn_relu_conv_kernel(%arg0: i32, %arg1: memref<1x20x384xf32, #tpu.memory_space<vmem>>, %arg2: memref<1x384xf32, #tpu.memory_space<vmem>>, %arg3: memref<20x1xf32, #tpu.memory_space<vmem>>, %arg4: memref<20x1xf32, #tpu.memory_space<vmem>>, %arg5: memref<9x8x20xbf16, #tpu.memory_space<vmem>>, %arg6: memref<8x1xf32, #tpu.memory_space<vmem>>, %arg7: memref<1x8x324xf32, #tpu.memory_space<vmem>>) attributes {dimension_semantics = [#tpu.dimension_semantics<parallel>], iteration_bounds = array<i64: 2>, scalar_prefetch = 0 : i64, scratch_operands = 0 : i64, tpu.core_type = #tpu.core_type<tc>, window_params = [{transform_indices = @transform_0, window_bounds = array<i64: 1, 20, 384>}, {pipeline_mode = #tpu.pipeline_mode<synchronous>, transform_indices = @transform_1, window_bounds = array<i64: 1, 384>}, {pipeline_mode = #tpu.pipeline_mode<synchronous>, transform_indices = @transform_2, window_bounds = array<i64: 20, 1>}, {pipeline_mode = #tpu.pipeline_mode<synchronous>, transform_indices = @transform_3, window_bounds = array<i64: 20, 1>}, {pipeline_mode = #tpu.pipeline_mode<synchronous>, transform_indices = @transform_4, window_bounds = array<i64: 9, 8, 20>}, {pipeline_mode = #tpu.pipeline_mode<synchronous>, transform_indices = @transform_5, window_bounds = array<i64: 8, 1>}, {transform_indices = @transform_6, window_bounds = array<i64: 1, 8, 324>}]} {
    %c0 = arith.constant 0 : index
    %c0_0 = arith.constant 0 : index
    %c0_1 = arith.constant 0 : index
    %0 = vector.load %arg1[%c0, %c0_0, %c0_1] : memref<1x20x384xf32, #tpu.memory_space<vmem>>, vector<1x20x384xf32>
    %1 = vector.shape_cast %0 : vector<1x20x384xf32> to vector<20x384xf32>
    %c0_2 = arith.constant 0 : index
    %c0_3 = arith.constant 0 : index
    %2 = vector.load %arg3[%c0_2, %c0_3] : memref<20x1xf32, #tpu.memory_space<vmem>>, vector<20x1xf32>
    %3 = vector.broadcast %2 : vector<20x1xf32> to vector<20x384xf32>
    %4 = arith.mulf %1, %3 : vector<20x384xf32>
    %c0_4 = arith.constant 0 : index
    %c0_5 = arith.constant 0 : index
    %5 = vector.load %arg4[%c0_4, %c0_5] : memref<20x1xf32, #tpu.memory_space<vmem>>, vector<20x1xf32>
    %6 = vector.broadcast %5 : vector<20x1xf32> to vector<20x384xf32>
    %7 = arith.addf %4, %6 : vector<20x384xf32>
    %cst = arith.constant 0.000000e+00 : f32
    %8 = vector.broadcast %cst : f32 to vector<20x384xf32>
    %9 = arith.maximumf %7, %8 : vector<20x384xf32>
    %c0_6 = arith.constant 0 : index
    %c0_7 = arith.constant 0 : index
    %10 = vector.load %arg2[%c0_6, %c0_7] : memref<1x384xf32, #tpu.memory_space<vmem>>, vector<1x384xf32>
    %11 = vector.broadcast %10 : vector<1x384xf32> to vector<20x384xf32>
    %12 = arith.mulf %9, %11 : vector<20x384xf32>
    %13 = arith.truncf %12 : vector<20x384xf32> to vector<20x384xbf16>
    %cst_8 = arith.constant 0.000000e+00 : f32
    %14 = vector.broadcast %cst_8 : f32 to vector<8x324xf32>
    %15 = vector.extract_strided_slice %13 {offsets = [0, 0], sizes = [20, 324], strides = [1, 1]} : vector<20x384xbf16> to vector<20x324xbf16>
    %c0_9 = arith.constant 0 : index
    %c0_10 = arith.constant 0 : index
    %c0_11 = arith.constant 0 : index
    %16 = vector.load %arg5[%c0_9, %c0_10, %c0_11] : memref<9x8x20xbf16, #tpu.memory_space<vmem>>, vector<1x8x20xbf16>
    %17 = vector.shape_cast %16 : vector<1x8x20xbf16> to vector<8x20xbf16>
    %cst_12 = arith.constant dense<0.000000e+00> : vector<8x324xf32>
    %18 = tpu.matmul %17, %15, %cst_12 {dimension_numbers = #tpu.dot_dimension_numbers<[1], [0], [0], [1], [0, 0, 1, 1], [], []>} : vector<8x20xbf16>, vector<20x324xbf16>, vector<8x324xf32> -> vector<8x324xf32>
    %19 = arith.addf %14, %18 : vector<8x324xf32>
    %20 = vector.extract_strided_slice %13 {offsets = [0, 1], sizes = [20, 324], strides = [1, 1]} : vector<20x384xbf16> to vector<20x324xbf16>
    %c1 = arith.constant 1 : index
    %c0_13 = arith.constant 0 : index
    %c0_14 = arith.constant 0 : index
    %21 = vector.load %arg5[%c1, %c0_13, %c0_14] : memref<9x8x20xbf16, #tpu.memory_space<vmem>>, vector<1x8x20xbf16>
    %22 = vector.shape_cast %21 : vector<1x8x20xbf16> to vector<8x20xbf16>
    %cst_15 = arith.constant dense<0.000000e+00> : vector<8x324xf32>
    %23 = tpu.matmul %22, %20, %cst_15 {dimension_numbers = #tpu.dot_dimension_numbers<[1], [0], [0], [1], [0, 0, 1, 1], [], []>} : vector<8x20xbf16>, vector<20x324xbf16>, vector<8x324xf32> -> vector<8x324xf32>
    %24 = arith.addf %19, %23 : vector<8x324xf32>
    %25 = vector.extract_strided_slice %13 {offsets = [0, 2], sizes = [20, 324], strides = [1, 1]} : vector<20x384xbf16> to vector<20x324xbf16>
    %c2 = arith.constant 2 : index
    %c0_16 = arith.constant 0 : index
    %c0_17 = arith.constant 0 : index
    %26 = vector.load %arg5[%c2, %c0_16, %c0_17] : memref<9x8x20xbf16, #tpu.memory_space<vmem>>, vector<1x8x20xbf16>
    %27 = vector.shape_cast %26 : vector<1x8x20xbf16> to vector<8x20xbf16>
    %cst_18 = arith.constant dense<0.000000e+00> : vector<8x324xf32>
    %28 = tpu.matmul %27, %25, %cst_18 {dimension_numbers = #tpu.dot_dimension_numbers<[1], [0], [0], [1], [0, 0, 1, 1], [], []>} : vector<8x20xbf16>, vector<20x324xbf16>, vector<8x324xf32> -> vector<8x324xf32>
    %29 = arith.addf %24, %28 : vector<8x324xf32>
    %30 = vector.extract_strided_slice %13 {offsets = [0, 18], sizes = [20, 324], strides = [1, 1]} : vector<20x384xbf16> to vector<20x324xbf16>
    %c3 = arith.constant 3 : index
    %c0_19 = arith.constant 0 : index
    %c0_20 = arith.constant 0 : index
    %31 = vector.load %arg5[%c3, %c0_19, %c0_20] : memref<9x8x20xbf16, #tpu.memory_space<vmem>>, vector<1x8x20xbf16>
    %32 = vector.shape_cast %31 : vector<1x8x20xbf16> to vector<8x20xbf16>
    %cst_21 = arith.constant dense<0.000000e+00> : vector<8x324xf32>
    %33 = tpu.matmul %32, %30, %cst_21 {dimension_numbers = #tpu.dot_dimension_numbers<[1], [0], [0], [1], [0, 0, 1, 1], [], []>} : vector<8x20xbf16>, vector<20x324xbf16>, vector<8x324xf32> -> vector<8x324xf32>
    %34 = arith.addf %29, %33 : vector<8x324xf32>
    %35 = vector.extract_strided_slice %13 {offsets = [0, 19], sizes = [20, 324], strides = [1, 1]} : vector<20x384xbf16> to vector<20x324xbf16>
    %c4 = arith.constant 4 : index
    %c0_22 = arith.constant 0 : index
    %c0_23 = arith.constant 0 : index
    %36 = vector.load %arg5[%c4, %c0_22, %c0_23] : memref<9x8x20xbf16, #tpu.memory_space<vmem>>, vector<1x8x20xbf16>
    %37 = vector.shape_cast %36 : vector<1x8x20xbf16> to vector<8x20xbf16>
    %cst_24 = arith.constant dense<0.000000e+00> : vector<8x324xf32>
    %38 = tpu.matmul %37, %35, %cst_24 {dimension_numbers = #tpu.dot_dimension_numbers<[1], [0], [0], [1], [0, 0, 1, 1], [], []>} : vector<8x20xbf16>, vector<20x324xbf16>, vector<8x324xf32> -> vector<8x324xf32>
    %39 = arith.addf %34, %38 : vector<8x324xf32>
    %40 = vector.extract_strided_slice %13 {offsets = [0, 20], sizes = [20, 324], strides = [1, 1]} : vector<20x384xbf16> to vector<20x324xbf16>
    %c5 = arith.constant 5 : index
    %c0_25 = arith.constant 0 : index
    %c0_26 = arith.constant 0 : index
    %41 = vector.load %arg5[%c5, %c0_25, %c0_26] : memref<9x8x20xbf16, #tpu.memory_space<vmem>>, vector<1x8x20xbf16>
    %42 = vector.shape_cast %41 : vector<1x8x20xbf16> to vector<8x20xbf16>
    %cst_27 = arith.constant dense<0.000000e+00> : vector<8x324xf32>
    %43 = tpu.matmul %42, %40, %cst_27 {dimension_numbers = #tpu.dot_dimension_numbers<[1], [0], [0], [1], [0, 0, 1, 1], [], []>} : vector<8x20xbf16>, vector<20x324xbf16>, vector<8x324xf32> -> vector<8x324xf32>
    %44 = arith.addf %39, %43 : vector<8x324xf32>
    %45 = vector.extract_strided_slice %13 {offsets = [0, 36], sizes = [20, 324], strides = [1, 1]} : vector<20x384xbf16> to vector<20x324xbf16>
    %c6 = arith.constant 6 : index
    %c0_28 = arith.constant 0 : index
    %c0_29 = arith.constant 0 : index
    %46 = vector.load %arg5[%c6, %c0_28, %c0_29] : memref<9x8x20xbf16, #tpu.memory_space<vmem>>, vector<1x8x20xbf16>
    %47 = vector.shape_cast %46 : vector<1x8x20xbf16> to vector<8x20xbf16>
    %cst_30 = arith.constant dense<0.000000e+00> : vector<8x324xf32>
    %48 = tpu.matmul %47, %45, %cst_30 {dimension_numbers = #tpu.dot_dimension_numbers<[1], [0], [0], [1], [0, 0, 1, 1], [], []>} : vector<8x20xbf16>, vector<20x324xbf16>, vector<8x324xf32> -> vector<8x324xf32>
    %49 = arith.addf %44, %48 : vector<8x324xf32>
    %50 = vector.extract_strided_slice %13 {offsets = [0, 37], sizes = [20, 324], strides = [1, 1]} : vector<20x384xbf16> to vector<20x324xbf16>
    %c7 = arith.constant 7 : index
    %c0_31 = arith.constant 0 : index
    %c0_32 = arith.constant 0 : index
    %51 = vector.load %arg5[%c7, %c0_31, %c0_32] : memref<9x8x20xbf16, #tpu.memory_space<vmem>>, vector<1x8x20xbf16>
    %52 = vector.shape_cast %51 : vector<1x8x20xbf16> to vector<8x20xbf16>
    %cst_33 = arith.constant dense<0.000000e+00> : vector<8x324xf32>
    %53 = tpu.matmul %52, %50, %cst_33 {dimension_numbers = #tpu.dot_dimension_numbers<[1], [0], [0], [1], [0, 0, 1, 1], [], []>} : vector<8x20xbf16>, vector<20x324xbf16>, vector<8x324xf32> -> vector<8x324xf32>
    %54 = arith.addf %49, %53 : vector<8x324xf32>
    %55 = vector.extract_strided_slice %13 {offsets = [0, 38], sizes = [20, 324], strides = [1, 1]} : vector<20x384xbf16> to vector<20x324xbf16>
    %c8 = arith.constant 8 : index
    %c0_34 = arith.constant 0 : index
    %c0_35 = arith.constant 0 : index
    %56 = vector.load %arg5[%c8, %c0_34, %c0_35] : memref<9x8x20xbf16, #tpu.memory_space<vmem>>, vector<1x8x20xbf16>
    %57 = vector.shape_cast %56 : vector<1x8x20xbf16> to vector<8x20xbf16>
    %cst_36 = arith.constant dense<0.000000e+00> : vector<8x324xf32>
    %58 = tpu.matmul %57, %55, %cst_36 {dimension_numbers = #tpu.dot_dimension_numbers<[1], [0], [0], [1], [0, 0, 1, 1], [], []>} : vector<8x20xbf16>, vector<20x324xbf16>, vector<8x324xf32> -> vector<8x324xf32>
    %59 = arith.addf %54, %58 : vector<8x324xf32>
    %c0_37 = arith.constant 0 : index
    %c0_38 = arith.constant 0 : index
    %60 = vector.load %arg6[%c0_37, %c0_38] : memref<8x1xf32, #tpu.memory_space<vmem>>, vector<8x1xf32>
    %61 = vector.broadcast %60 : vector<8x1xf32> to vector<8x324xf32>
    %62 = arith.addf %59, %61 : vector<8x324xf32>
    %c0_39 = arith.constant 0 : index
    %c0_40 = arith.constant 0 : index
    %c0_41 = arith.constant 0 : index
    %63 = vector.load %arg7[%c0_39, %c0_40, %c0_41] : memref<1x8x324xf32, #tpu.memory_space<vmem>>, vector<1x8x324xf32>
    %64 = vector.shape_cast %63 : vector<1x8x324xf32> to vector<8x324xf32>
    %65 = vector.shape_cast %62 : vector<8x324xf32> to vector<1x8x324xf32>
    tpu.vector_store %arg7[%c0_39, %c0_40, %c0_41], %65 {strides = array<i32>} : memref<1x8x324xf32, #tpu.memory_space<vmem>>, vector<1x8x324xf32>,
    return
  }
  func.func @transform_0(%arg0: i32) -> (i32, i32, i32) {
    %c0_i32 = arith.constant 0 : i32
    %c0_i32_0 = arith.constant 0 : i32
    %c0_i32_1 = arith.constant 0 : i32
    return %arg0, %c0_i32, %c0_i32_0 : i32, i32, i32
  }
  func.func @transform_1(%arg0: i32) -> (i32, i32) {
    %c0_i32 = arith.constant 0 : i32
    %c0_i32_0 = arith.constant 0 : i32
    %c0_i32_1 = arith.constant 0 : i32
    return %c0_i32, %c0_i32_0 : i32, i32
  }
  func.func @transform_2(%arg0: i32) -> (i32, i32) {
    %c0_i32 = arith.constant 0 : i32
    %c0_i32_0 = arith.constant 0 : i32
    %c0_i32_1 = arith.constant 0 : i32
    return %c0_i32, %c0_i32_0 : i32, i32
  }
  func.func @transform_3(%arg0: i32) -> (i32, i32) {
    %c0_i32 = arith.constant 0 : i32
    %c0_i32_0 = arith.constant 0 : i32
    %c0_i32_1 = arith.constant 0 : i32
    return %c0_i32, %c0_i32_0 : i32, i32
  }
  func.func @transform_4(%arg0: i32) -> (i32, i32, i32) {
    %c0_i32 = arith.constant 0 : i32
    %c0_i32_0 = arith.constant 0 : i32
    %c0_i32_1 = arith.constant 0 : i32
    %c0_i32_2 = arith.constant 0 : i32
    return %c0_i32, %c0_i32_0, %c0_i32_1 : i32, i32, i32
  }
  func.func @transform_5(%arg0: i32) -> (i32, i32) {
    %c0_i32 = arith.constant 0 : i32
    %c0_i32_0 = arith.constant 0 : i32
    %c0_i32_1 = arith.constant 0 : i32
    return %c0_i32, %c0_i32_0 : i32, i32
  }
  func.func @transform_6(%arg0: i32) -> (i32, i32, i32) {
    %c0_i32 = arith.constant 0 : i32
    %c0_i32_0 = arith.constant 0 : i32
    %c0_i32_1 = arith.constant 0 : i32
    return %arg0, %c0_i32, %c0_i32_0 : i32, i32, i32
  }
}

</mosaic_0001>

<bundles_post_ra>
// kernel: dense_block_forward.3
= control target key start
LH: loop header
LB: loop body
LE: loop exit
PB: predicated region body
PF: predicated region fallthrough
CT: control target
= control target key end

     0   :  { %s1526_s21 = smov 0   ;;  %s1670_s0 = inlined_call_operand.vmem [shape: f32[2,4,384], index: 0, kind: input, shape index: {}]   ;;  %s1671_s1 = inlined_call_operand.vmem [shape: f32[1,384], index: 1, kind: input, shape index: {}]   ;;  %s1672_s2 = inlined_call_operand.vmem [shape: f32[4,1], index: 2, kind: input, shape index: {}]   ;;  %s1673_s3 = inlined_call_operand.vmem [shape: f32[4,1], index: 3, kind: input, shape index: {}]   ;;  %s1674_s4 = inlined_call_operand.vmem [shape: bf16[9,8,4], index: 4, kind: input, shape index: {}]   ;;  %s1675_s5 = inlined_call_operand.vmem [shape: f32[8,1], index: 5, kind: input, shape index: {}]   ;;  %s1676_s6 = inlined_call_operand.vmem [shape: f32[2,8,324], index: 6, kind: output, shape index: {}]  }
   0x1 LB: > { %s1332_s22 = sadd.s32 4294967295, %s1477_s21   ;;  %p1336_p0 = scmp.ge.s32.totalorder %s1477_s21, 1  ;;  %s1477_s21 = sphi %s1526_s21, %s16_s21  }
   0x2   : > { %p212_p1 = scmp.lt.s32.totalorder %s1477_s21, 3 }
   0x4   : > { %p213_p2 = pnand %p1336_p0, %p212_p1 }
   0x5   : > { %p242_p3 = scmp.lt.s32.totalorder (!%p213_p2), %s1332_s22, 1  ;;  %s1483_s9 = smov (!%p213_p2), 127  }
   0x6   : > { %216 = sbr.rel (%p213_p2) target bundleno = 539 (0x21b), region = 44  ;;  %s1484_s10 = smov (!%p213_p2), 126  }
   0x7   : > { %s1485_s11 = smov (!%p213_p2), 110   ;;  %s1486_s12 = smov (!%p213_p2), 109  }
   0x8   : > { %s1487_s13 = smov (!%p213_p2), 108   ;;  %s1488_s14 = smov (!%p213_p2), 92  }
   0x9   : > { %s1489_s15 = smov (!%p213_p2), 91   ;;  %s1490_s16 = smov (!%p213_p2), 90  }
   0xb   : > { %v255_v0 = vld [vmem:[%s1672_s2] sm:$0xf]  ;;  %v1479_v1 = vmov 0   ;;  %v1480_v3 = vmov 839922192   ;;  %v263_v5 = vlaneseq  ;;  %s1678_s22 = smov (!%p242_p3, %s1332_s22), 1 }
   0xc   : > { %1470 = vset.pattern.permute.xlu0 %v1479_v1  ;;  %373 = vmatprep.mubr.bf16.mxu0 %v1479_v1  ;;  %v270_v2 = vld [vmem:[%s1673_s3] sm:$0xf]  ;;  %v261_v4 = vunpack.c.l.s4 %v1480_v3  ;;  %s1448_s27 = smul.u32 12, %s1678_s22  ;;  %v1481_v16 = vmov 0.0   ;;  %vm1482_vm0 = vmmov 0   ;;  %vm331_vm1 = vcmask 1041408  }
   0xd   : > { %258 = vperm.xlu0 %1470, %v255_v0   ;;  %v264_v7 = vshrl.u32 %v263_v5, 7  ;;  %v287_v12 = vld [vmem:[%s1671_s1] sm:$0x7]  ;;  %1394 = vmatprep.subr.bf16.mxu1 %v1481_v16  ;;  %v1339_v40 = vld [vmem:[%s1674_s4 + $0x4] sm:$0xf]  ;;  %vm327_vm2 = vcmask 31744  }
   0xe   : > { %v262_v6 = vunpack.c.0.s8 %v261_v4  ;;  %s246_s30 = scalar_lea.vmem %s1670_s0, %s1448_s27  ;;  %1396 = vmatprep.mubr.msk.bf16.mxu1 %vm1482_vm0, %v1481_v16  ;;  %v1264_v36 = vld [vmem:[%s1675_s5] sm:$0xff]  ;;  %vm324_vm3 = vcmask 1039360   ;;  %vm523_vm4 = vcmask 1031168   ;;  %vm630_vm5 = vcmask 900096   ;;  %v1346_v59 = vld [vmem:[%s1674_s4 + $0x8] sm:$0xf] }
   0xf   : > { %v291_v9 = vsub.s32 0, %v264_v7  ;;  %v295_v10 = vsub.s32 1, %v264_v7  ;;  %v253_v14 = vld [vmem:[%s246_s30] sm:$0xff]  ;;  %v254_v15 = vld [vmem:[%s246_s30 + $0x8] sm:$0xf]  ;;  %v299_v19 = vsub.s32 2, %v264_v7 }
  0x10   : > { %v265_v8 = vsub.s32 %v262_v6, %v264_v7  ;;  %v312_v50 = vld [vmem:[%s1674_s4] sm:$0xf]  ;;  %vm737_vm6 = vcmask 891904   ;;  %v1350_v5 = vld [vmem:[%s1674_s4 + $0xc] sm:$0xf]  ;;  %vm844_vm7 = vcmask 883712  }
  0x11   : > { %273 = vperm.xlu0 %1470, %v270_v2   ;;  %v292_v17 = vrot.slane %v287_v12, %v291_v9  ;;  %v296_v18 = vrot.slane %v287_v12, %v295_v10  ;;  %v300_v24 = vrot.slane %v287_v12, %v299_v19  ;;  %v1354_v12 = vld [vmem:[%s1674_s4 + $0x10] sm:$0xf]  ;;  %vm951_vm8 = vcmask 752640  }
  0x12   : > { %vm1058_vm9 = vcmask 744448   ;;  %vm1165_vm10 = vcmask 736256   ;;  %vm1275_vm11 = vcmask 556032  }
  0x13   : > { %v302_v25 = vcombine.low %v292_v17, %v296_v18 }
  0x88   : > { %v259_v11 = vpop.permute.xlu0 %258 }
  0x89   : > { %v266_v13 = vrot.slane %v259_v11, %v265_v8 }
  0x8b   : > { %v268_v21 = vmul.f32 %v266_v13, %v253_v14  ;;  %v269_v22 = vmul.f32 %v266_v13, %v254_v15 }
  0x8c   : > { %v274_v20 = vpop.permute.xlu0 %273 }
  0x8d   : > { %v281_v23 = vrot.slane %v274_v20, %v265_v8  ;;  %v1358_v20 = vld [vmem:[%s1674_s4 + $0x14] sm:$0xf] }
  0x8f   : > { %v283_v26 = vadd.f32 %v281_v23, %v268_v21  ;;  %v284_v27 = vadd.f32 %v281_v23, %v269_v22 }
  0x91   : > { %v285_v28 = vmax.f32 %v283_v26, 0.0  ;;  %v286_v29 = vmax.f32 %v284_v27, 0.0 }
  0x93   : > { %v304_v30 = vmul.f32 %v302_v25, %v285_v28  ;;  %v305_v31 = vmul.f32 %v300_v24, %v286_v29  ;;  %v1362_v29 = vld [vmem:[%s1674_s4 + $0x18] sm:$0xf] }
  0x95   : > { %v307_v32 = vcombine.high %v304_v30, %v304_v30  ;;  %v309_v33 = vpack.c.bf16 %v304_v30, %v304_v30  ;;  %v311_v34 = vpack.c.bf16 %v305_v31, %v305_v31 }
  0x97   : > { %322 = vrot.lane.b32.xlu0 %v311_v34, %s1483_s9  ;;  %318 = vrot.lane.b32.xlu1 %v309_v33, %s1483_s9  ;;  %v310_v35 = vpack.c.bf16 %v307_v32, %v307_v32  ;;  %v432_v44 = vsel %vm331_vm1, %v311_v34, 0  ;;  %v426_v49 = vsel %vm331_vm1, %v309_v33, 0 }
  0x9b   : > { %519 = vrot.lane.b32.xlu0 %v310_v35, %s1484_s10  ;;  %320 = vrot.lane.b32.xlu1 %v310_v35, %s1483_s9 }
  0x9f   : > { %624 = vrot.lane.b32.xlu0 %v309_v33, %s1485_s11  ;;  %517 = vrot.lane.b32.xlu1 %v309_v33, %s1484_s10 }
  0xa3   : > { %628 = vrot.lane.b32.xlu0 %v311_v34, %s1485_s11  ;;  %521 = vrot.lane.b32.xlu1 %v311_v34, %s1484_s10 }
  0xa7   : > { %733 = vrot.lane.b32.xlu0 %v310_v35, %s1486_s12  ;;  %626 = vrot.lane.b32.xlu1 %v310_v35, %s1485_s11 }
  0xab   : > { %838 = vrot.lane.b32.xlu0 %v309_v33, %s1487_s13  ;;  %731 = vrot.lane.b32.xlu1 %v309_v33, %s1486_s12 }
  0xaf   : > { %842 = vrot.lane.b32.xlu0 %v311_v34, %s1487_s13  ;;  %735 = vrot.lane.b32.xlu1 %v311_v34, %s1486_s12 }
  0xb3   : > { %947 = vrot.lane.b32.xlu0 %v310_v35, %s1488_s14  ;;  %840 = vrot.lane.b32.xlu1 %v310_v35, %s1487_s13 }
  0xb7   : > { %1052 = vrot.lane.b32.xlu0 %v309_v33, %s1489_s15  ;;  %945 = vrot.lane.b32.xlu1 %v309_v33, %s1488_s14 }
  0xbb   : > { %1056 = vrot.lane.b32.xlu0 %v311_v34, %s1489_s15  ;;  %949 = vrot.lane.b32.xlu1 %v311_v34, %s1488_s14 }
  0xbf   : > { %1161 = vrot.lane.b32.xlu0 %v310_v35, %s1490_s16  ;;  %1054 = vrot.lane.b32.xlu1 %v310_v35, %s1489_s15  ;;  %s1449_s15 = smul.u32 24, %s1678_s22 }
  0xc1   : > { %s251_s18 = scalar_lea.vmem %s1676_s6, %s1449_s15 }
  0xc3   : > { %1267 = vperm.xlu0 %1470, %v1264_v36   ;;  %1159 = vrot.lane.b32.xlu1 %v309_v33, %s1490_s16  ;;  %v1366_v36 = vld [vmem:[%s1674_s4 + $0x1c] sm:$0xf] }
  0xc7   : > { %1163 = vrot.lane.b32.xlu1 %v311_v34, %s1490_s16 }
 0x109   : > { %v323_v37 = vpop.permute.xlu0 %322  ;;  %v319_v38 = vpop.permute.xlu1 %318 }
 0x10a   : > { %v339_v39 = vsel %vm331_vm1, %v323_v37, 0 }
 0x10b   : > { %1395 = vmatpush3.bf16.msra.mxu1 %v339_v39 }
 0x10c   : > { %1400 = vmatprep.subr.bf16.mxu1 %v1481_v16 }
 0x10d   : > { %v520_v41 = vpop.permute.xlu0 %519  ;;  %v321_v42 = vpop.permute.xlu1 %320 }
 0x10e   : > { %1397 = vmatmul.mubr.msk.bf16.vlgmr.msra.gmra.mxu1 %vm327_vm2, %v1339_v40  ;;  %v326_v43 = vsel %vm324_vm3, %v321_v42, %v323_v37  ;;  %v325_v45 = vsel %vm324_vm3, %v319_v38, %v321_v42 }
 0x10f   : > { %1340 = vmatprep.subr.msk.bf16.mxu0 %vm331_vm1, %v326_v43  ;;  %1401 = vmatpush3.bf16.msra.mxu1 %v432_v44  ;;  %v333_v46 = vsel %vm331_vm1, %v325_v45, 0 }
 0x110   : > { %356 = vmatpush1.bf16.msra.mxu0 %v333_v46  ;;  %1402 = vmatprep.mubr.msk.bf16.mxu1 %vm1482_vm0, %v1481_v16 }
 0x111   : > { %v625_v47 = vpop.permute.xlu0 %624  ;;  %1343 = vmatprep.subr.msk.bf16.mxu0 %vm331_vm1, %v310_v35  ;;  %v518_v48 = vpop.permute.xlu1 %517  ;;  %1406 = vmatprep.subr.bf16.mxu1 %v1481_v16 }
 0x112   : > { %v524_v55 = vsel %vm523_vm4, %v518_v48, %v520_v41 }
 0x113   : > { %1341 = vmatmul.mubr.msk.bf16.vlgmr.msra.gmra.mxu0 %vm327_vm2, %v1339_v40  ;;  %v530_v58 = vsel %vm331_vm1, %v524_v55, 0 }
 0x114   : > { %449 = vmatpush1.bf16.msra.mxu0 %v426_v49  ;;  %466 = vmatprep.mubr.bf16.mxu0 %v1479_v1 }
 0x115   : > { %v522_v51 = vpop.permute.xlu1 %521  ;;  %v629_v54 = vpop.permute.xlu0 %628 }
 0x116   : > { %v525_v52 = vsel %vm523_vm4, %v520_v41, %v522_v51  ;;  %v536_v53 = vsel %vm331_vm1, %v522_v51, 0  ;;  %1403 = vmatmul.mubr.msk.bf16.vlgmr.msra.gmra.mxu1 %vm327_vm2, %v312_v50  ;;  %v643_v62 = vsel %vm331_vm1, %v629_v54, 0  ;;  %v1370_v41 = vld [vmem:[%s1674_s4 + $0x20] sm:$0xf] }
 0x117   : > { %1347 = vmatprep.subr.msk.bf16.mxu0 %vm331_vm1, %v525_v52  ;;  %1407 = vmatpush3.bf16.msra.mxu1 %v536_v53 }
 0x118   : > { %1408 = vmatprep.mubr.msk.bf16.mxu1 %vm1482_vm0, %v1481_v16  ;;  %1412 = vmatprep.subr.bf16.mxu1 %v1481_v16 }
 0x119   : > { %v627_v56 = vpop.permute.xlu1 %626  ;;  %v734_v60 = vpop.permute.xlu0 %733 }
 0x11a   : > { %v632_v57 = vsel %vm630_vm5, %v627_v56, %v629_v54  ;;  %v631_v63 = vsel %vm630_vm5, %v625_v47, %v627_v56 }
 0x11b   : > { %1344 = vmatmul.mubr.msk.bf16.vlgmr.msra.gmra.mxu0 %vm327_vm2, %v312_v50  ;;  %v637_v3 = vsel %vm331_vm1, %v631_v63, 0 }
 0x11c   : > { %553 = vmatpush1.bf16.msra.mxu0 %v530_v58  ;;  %570 = vmatprep.mubr.bf16.mxu0 %v1479_v1 }
 0x11d   : > { %1351 = vmatprep.subr.msk.bf16.mxu0 %vm331_vm1, %v632_v57  ;;  %v732_v61 = vpop.permute.xlu1 %731  ;;  %v839_v4 = vpop.permute.xlu0 %838 }
 0x11e   : > { %1409 = vmatmul.mubr.msk.bf16.vlgmr.msra.gmra.mxu1 %vm327_vm2, %v1346_v59  ;;  %v738_v8 = vsel %vm737_vm6, %v732_v61, %v734_v60 }
 0x11f   : > { %1413 = vmatpush3.bf16.msra.mxu1 %v643_v62  ;;  %1414 = vmatprep.mubr.msk.bf16.mxu1 %vm1482_vm0, %v1481_v16  ;;  %v744_v11 = vsel %vm331_vm1, %v738_v8, 0 }
 0x120   : > { %1418 = vmatprep.subr.bf16.mxu1 %v1481_v16 }
 0x121   : > { %v736_v0 = vpop.permute.xlu1 %735  ;;  %v843_v9 = vpop.permute.xlu0 %842 }
 0x122   : > { %v739_v2 = vsel %vm737_vm6, %v734_v60, %v736_v0  ;;  %v750_v7 = vsel %vm331_vm1, %v736_v0, 0  ;;  %v857_v14 = vsel %vm331_vm1, %v843_v9, 0 }
 0x123   : > { %1348 = vmatmul.mubr.msk.bf16.vlgmr.msra.gmra.mxu0 %vm327_vm2, %v1346_v59 }
 0x124   : > { %660 = vmatpush1.bf16.msra.mxu0 %v637_v3  ;;  %677 = vmatprep.mubr.bf16.mxu0 %v1479_v1 }
 0x125   : > { %1355 = vmatprep.subr.msk.bf16.mxu0 %vm331_vm1, %v739_v2  ;;  %v841_v6 = vpop.permute.xlu1 %840  ;;  %v948_v15 = vpop.permute.xlu0 %947 }
 0x126   : > { %1415 = vmatmul.mubr.msk.bf16.vlgmr.msra.gmra.mxu1 %vm327_vm2, %v1350_v5  ;;  %v846_v13 = vsel %vm844_vm7, %v841_v6, %v843_v9  ;;  %v845_v18 = vsel %vm844_vm7, %v839_v4, %v841_v6 }
 0x127   : > { %1419 = vmatpush3.bf16.msra.mxu1 %v750_v7  ;;  %1420 = vmatprep.mubr.msk.bf16.mxu1 %vm1482_vm0, %v1481_v16  ;;  %v851_v19 = vsel %vm331_vm1, %v845_v18, 0 }
 0x128   : > { %1424 = vmatprep.subr.bf16.mxu1 %v1481_v16 }
 0x129   : > { %v946_v10 = vpop.permute.xlu1 %945  ;;  %v1053_v22 = vpop.permute.xlu0 %1052 }
 0x12a   : > { %v952_v25 = vsel %vm951_vm8, %v946_v10, %v948_v15 }
 0x12b   : > { %1352 = vmatmul.mubr.msk.bf16.vlgmr.msra.gmra.mxu0 %vm327_vm2, %v1350_v5  ;;  %v958_v26 = vsel %vm331_vm1, %v952_v25, 0 }
 0x12c   : > { %767 = vmatpush1.bf16.msra.mxu0 %v744_v11  ;;  %784 = vmatprep.mubr.bf16.mxu0 %v1479_v1 }
 0x12d   : > { %1359 = vmatprep.subr.msk.bf16.mxu0 %vm331_vm1, %v846_v13  ;;  %v950_v17 = vpop.permute.xlu1 %949  ;;  %v1057_v27 = vpop.permute.xlu0 %1056 }
 0x12e   : > { %1421 = vmatmul.mubr.msk.bf16.vlgmr.msra.gmra.mxu1 %vm327_vm2, %v1354_v12  ;;  %v953_v21 = vsel %vm951_vm8, %v948_v15, %v950_v17  ;;  %v964_v24 = vsel %vm331_vm1, %v950_v17, 0  ;;  %v1071_v31 = vsel %vm331_vm1, %v1057_v27, 0 }
 0x12f   : > { %1425 = vmatpush3.bf16.msra.mxu1 %v857_v14  ;;  %1426 = vmatprep.mubr.msk.bf16.mxu1 %vm1482_vm0, %v1481_v16 }
 0x130   : > { %1430 = vmatprep.subr.bf16.mxu1 %v1481_v16 }
 0x131   : > { %v1055_v23 = vpop.permute.xlu1 %1054  ;;  %v1162_v34 = vpop.permute.xlu0 %1161 }
 0x132   : > { %v1060_v30 = vsel %vm1058_vm9, %v1055_v23, %v1057_v27  ;;  %v1059_v32 = vsel %vm1058_vm9, %v1053_v22, %v1055_v23 }
 0x133   : > { %1356 = vmatmul.mubr.msk.bf16.vlgmr.msra.gmra.mxu0 %vm327_vm2, %v1354_v12  ;;  %v1065_v35 = vsel %vm331_vm1, %v1059_v32, 0 }
 0x134   : > { %874 = vmatpush1.bf16.msra.mxu0 %v851_v19  ;;  %891 = vmatprep.mubr.bf16.mxu0 %v1479_v1 }
 0x135   : > { %1363 = vmatprep.subr.msk.bf16.mxu0 %vm331_vm1, %v953_v21  ;;  %v1160_v28 = vpop.permute.xlu1 %1159 }
 0x136   : > { %1427 = vmatmul.mubr.msk.bf16.vlgmr.msra.gmra.mxu1 %vm327_vm2, %v1358_v20  ;;  %v1166_v39 = vsel %vm1165_vm10, %v1160_v28, %v1162_v34 }
 0x137   : > { %1431 = vmatpush3.bf16.msra.mxu1 %v964_v24  ;;  %1432 = vmatprep.mubr.msk.bf16.mxu1 %vm1482_vm0, %v1481_v16  ;;  %v1172_v40 = vsel %vm331_vm1, %v1166_v39, 0 }
 0x138   : > { %1436 = vmatprep.subr.bf16.mxu1 %v1481_v16 }
 0x139   : > { %v1164_v33 = vpop.permute.xlu1 %1163 }
 0x13a   : > { %v1167_v37 = vsel %vm1165_vm10, %v1162_v34, %v1164_v33  ;;  %v1178_v38 = vsel %vm331_vm1, %v1164_v33, 0 }
 0x13b   : > { %1360 = vmatmul.mubr.msk.bf16.vlgmr.msra.gmra.mxu0 %vm327_vm2, %v1358_v20 }
 0x13c   : > { %981 = vmatpush1.bf16.msra.mxu0 %v958_v26  ;;  %998 = vmatprep.mubr.bf16.mxu0 %v1479_v1 }
 0x13d   : > { %1367 = vmatprep.subr.msk.bf16.mxu0 %vm331_vm1, %v1060_v30 }
 0x13e   : > { %1433 = vmatmul.mubr.msk.bf16.vlgmr.msra.gmra.mxu1 %vm327_vm2, %v1362_v29 }
 0x13f   : > { %1437 = vmatpush3.bf16.msra.mxu1 %v1071_v31  ;;  %1438 = vmatprep.mubr.msk.bf16.mxu1 %vm1482_vm0, %v1481_v16 }
 0x140   : > { %1442 = vmatprep.subr.bf16.mxu1 %v1481_v16 }
 0x143   : > { %1364 = vmatmul.mubr.msk.bf16.vlgmr.msra.gmra.mxu0 %vm327_vm2, %v1362_v29 }
 0x144   : > { %1088 = vmatpush1.bf16.msra.mxu0 %v1065_v35  ;;  %1105 = vmatprep.mubr.bf16.mxu0 %v1479_v1 }
 0x145   : > { %1371 = vmatprep.subr.msk.bf16.mxu0 %vm331_vm1, %v1167_v37 }
 0x146   : > { %1439 = vmatmul.mubr.msk.bf16.vlgmr.msra.gmra.mxu1 %vm327_vm2, %v1366_v36 }
 0x147   : > { %1443 = vmatpush3.bf16.msra.mxu1 %v1178_v38  ;;  %1444 = vmatprep.mubr.msk.bf16.mxu1 %vm1482_vm0, %v1481_v16 }
 0x14b   : > { %1368 = vmatmul.mubr.msk.bf16.vlgmr.msra.gmra.mxu0 %vm327_vm2, %v1366_v36 }
 0x14c   : > { %1195 = vmatpush1.bf16.msra.mxu0 %v1172_v40  ;;  %1212 = vmatprep.mubr.bf16.mxu0 %v1479_v1 }
 0x14e   : > { %1445 = vmatmul.mubr.msk.bf16.vlgmr.msra.gmra.mxu1 %vm327_vm2, %v1370_v41 }
 0x153   : > { %1372 = vmatmul.mubr.msk.bf16.vlgmr.msra.gmra.mxu0 %vm327_vm2, %v1370_v41 }
 0x1ce   : > { %v416_v42 = vpop.f32.mrf.mxu1 }
 0x1d0   : > { %v1398_v43 = vpop.f32.mrf.mxu1 }
 0x1d2   : > { %v419_v44 = vpop.f32.mrf.mxu1 }
 0x1d3   : > { %v375_v16 = vpop.f32.mrf.mxu0 }
 0x1d4   : > { %v1399_v45 = vpop.f32.mrf.mxu1 }
 0x1d5   : > { %v377_v46 = vpop.f32.mrf.mxu0 }
 0x1d6   : > { %v509_v47 = vpop.f32.mrf.mxu1 }
 0x1d7   : > { %v379_v48 = vpop.f32.mrf.mxu0  ;;  %v510_v27 = vadd.f32 %v509_v47, %v416_v42 }
 0x1d8   : > { %v1404_v49 = vpop.f32.mrf.mxu1 }
 0x1d9   : > { %v380_v50 = vpop.f32.mrf.mxu0 }
 0x1da   : > { %v512_v51 = vpop.f32.mrf.mxu1 }
 0x1db   : > { %v468_v52 = vpop.f32.mrf.mxu0 }
 0x1dc   : > { %v1405_v53 = vpop.f32.mrf.mxu1  ;;  %v469_v35 = vadd.f32 %v468_v52, %v375_v16 }
 0x1dd   : > { %v470_v54 = vpop.f32.mrf.mxu0 }
 0x1de   : > { %v613_v55 = vpop.f32.mrf.mxu1  ;;  %v471_v39 = vadd.f32 %v470_v54, %v377_v46  ;;  %v1268_v54 = vpop.permute.xlu0 %1267 }
 0x1df   : > { %v472_v1 = vpop.f32.mrf.mxu0  ;;  %v621_v30 = vadd.f32 %v613_v55, %v510_v27 }
 0x1e0   : > { %v1410_v56 = vpop.f32.mrf.mxu1 }
 0x1e1   : > { %v473_v57 = vpop.f32.mrf.mxu0 }
 0x1e2   : > { %v616_v58 = vpop.f32.mrf.mxu1 }
 0x1e3   : > { %v572_v59 = vpop.f32.mrf.mxu0 }
 0x1e4   : > { %v1411_v60 = vpop.f32.mrf.mxu1  ;;  %v619_v40 = vadd.f32 %v572_v59, %v469_v35 }
 0x1e5   : > { %v574_v61 = vpop.f32.mrf.mxu0 }
 0x1e6   : > { %v720_v62 = vpop.f32.mrf.mxu1  ;;  %v620_v45 = vadd.f32 %v574_v61, %v471_v39 }
 0x1e7   : > { %v576_v63 = vpop.f32.mrf.mxu0  ;;  %v728_v33 = vadd.f32 %v720_v62, %v621_v30 }
 0x1e8   : > { %v1416_v0 = vpop.f32.mrf.mxu1 }
 0x1e9   : > { %v577_v2 = vpop.f32.mrf.mxu0 }
 0x1ea   : > { %v723_v3 = vpop.f32.mrf.mxu1 }
 0x1eb   : > { %v679_v4 = vpop.f32.mrf.mxu0 }
 0x1ec   : > { %v1417_v5 = vpop.f32.mrf.mxu1  ;;  %v726_v48 = vadd.f32 %v679_v4, %v619_v40 }
 0x1ed   : > { %v681_v6 = vpop.f32.mrf.mxu0 }
 0x1ee   : > { %v827_v7 = vpop.f32.mrf.mxu1  ;;  %v727_v50 = vadd.f32 %v681_v6, %v620_v45 }
 0x1ef   : > { %v683_v8 = vpop.f32.mrf.mxu0  ;;  %v835_v37 = vadd.f32 %v827_v7, %v728_v33 }
 0x1f0   : > { %v1422_v9 = vpop.f32.mrf.mxu1 }
 0x1f1   : > { %v684_v10 = vpop.f32.mrf.mxu0 }
 0x1f2   : > { %v830_v11 = vpop.f32.mrf.mxu1 }
 0x1f3   : > { %v786_v12 = vpop.f32.mrf.mxu0 }
 0x1f4   : > { %v1423_v13 = vpop.f32.mrf.mxu1  ;;  %v833_v51 = vadd.f32 %v786_v12, %v726_v48 }
 0x1f5   : > { %v788_v14 = vpop.f32.mrf.mxu0 }
 0x1f6   : > { %v934_v15 = vpop.f32.mrf.mxu1  ;;  %v834_v52 = vadd.f32 %v788_v14, %v727_v50 }
 0x1f7   : > { %v790_v17 = vpop.f32.mrf.mxu0  ;;  %v942_v43 = vadd.f32 %v934_v15, %v835_v37 }
 0x1f8   : > { %v1428_v18 = vpop.f32.mrf.mxu1 }
 0x1f9   : > { %v791_v19 = vpop.f32.mrf.mxu0 }
 0x1fa   : > { %v937_v20 = vpop.f32.mrf.mxu1 }
 0x1fb   : > { %v893_v21 = vpop.f32.mrf.mxu0 }
 0x1fc   : > { %v1429_v22 = vpop.f32.mrf.mxu1  ;;  %v940_v1 = vadd.f32 %v893_v21, %v833_v51 }
 0x1fd   : > { %v895_v23 = vpop.f32.mrf.mxu0 }
 0x1fe   : > { %v1041_v24 = vpop.f32.mrf.mxu1  ;;  %v941_v58 = vadd.f32 %v895_v23, %v834_v52 }
 0x1ff   : > { %v897_v25 = vpop.f32.mrf.mxu0  ;;  %v1049_v47 = vadd.f32 %v1041_v24, %v942_v43 }
 0x200   : > { %v1434_v26 = vpop.f32.mrf.mxu1 }
 0x201   : > { %v898_v28 = vpop.f32.mrf.mxu0 }
 0x202   : > { %v1044_v29 = vpop.f32.mrf.mxu1 }
 0x203   : > { %v1000_v31 = vpop.f32.mrf.mxu0 }
 0x204   : > { %v1435_v32 = vpop.f32.mrf.mxu1  ;;  %v1047_v59 = vadd.f32 %v1000_v31, %v940_v1 }
 0x205   : > { %v1002_v34 = vpop.f32.mrf.mxu0 }
 0x206   : > { %v1148_v36 = vpop.f32.mrf.mxu1  ;;  %v1048_v63 = vadd.f32 %v1002_v34, %v941_v58 }
 0x207   : > { %v1004_v38 = vpop.f32.mrf.mxu0  ;;  %v1156_v55 = vadd.f32 %v1148_v36, %v1049_v47 }
 0x208   : > { %v1440_v41 = vpop.f32.mrf.mxu1 }
 0x209   : > { %v1005_v44 = vpop.f32.mrf.mxu0 }
 0x20a   : > { %v1151_v42 = vpop.f32.mrf.mxu1 }
 0x20b   : > { %v1107_v49 = vpop.f32.mrf.mxu0 }
 0x20c   : > { %v1441_v53 = vpop.f32.mrf.mxu1  ;;  %v1154_v0 = vadd.f32 %v1107_v49, %v1047_v59 }
 0x20d   : > { %v1109_v16 = vpop.f32.mrf.mxu0 }
 0x20e   : > { %v1255_v56 = vpop.f32.mrf.mxu1  ;;  %v1155_v4 = vadd.f32 %v1109_v16, %v1048_v63 }
 0x20f   : > { %v1263_v57 = vadd.f32 %v1255_v56, %v1156_v55  ;;  %v1111_v46 = vpop.f32.mrf.mxu0 }
 0x210   : > { %v1446_v60 = vpop.f32.mrf.mxu1 }
 0x211   : > { %v1272_v61 = vadd.f32 %v1268_v54, %v1263_v57  ;;  %v1112_v62 = vpop.f32.mrf.mxu0 }
 0x212   : > { %v1258_v2 = vpop.f32.mrf.mxu1 }
 0x213   : > { %v1214_v3 = vpop.f32.mrf.mxu0  ;;  %1276 = vst.msk [vmem:[%s251_s18 + $0x10] sm:$0xff] %vm1275_vm11, %v1272_v61 }
 0x214   : > { %v1261_v5 = vadd.f32 %v1214_v3, %v1154_v0  ;;  %v1447_v6 = vpop.f32.mrf.mxu1 }
 0x215   : > { %v1216_v7 = vpop.f32.mrf.mxu0 }
 0x216   : > { %v1270_v8 = vadd.f32 %v1268_v54, %v1261_v5  ;;  %v1262_v9 = vadd.f32 %v1216_v7, %v1155_v4 }
 0x217   : > { %v1218_v10 = vpop.f32.mrf.mxu0 }
 0x218   : > { %1273 = vst [vmem:[%s251_s18] sm:$0xff] %v1270_v8  ;;  %v1271_v11 = vadd.f32 %v1268_v54, %v1262_v9 }
 0x219   : > { %v1219_v12 = vpop.f32.mrf.mxu0 }
 0x21a   : > { %1274 = vst [vmem:[%s251_s18 + $0x8] sm:$0xff] %v1271_v11 }
 0x21b PF: > { %s16_s21 = sadd.s32 1, %s1477_s21  }
 0x21c   : > { %p13_p4 = scmp.ge.s32.totalorder %s16_s21, 4  }
 0x21e   :  { %15 = sbr.rel (!%p13_p4) target bundleno = 1 (0x1), region = 82 }

// kernel: dense_block_forward.4
= control target key start
LH: loop header
LB: loop body
LE: loop exit
PB: predicated region body
PF: predicated region fallthrough
CT: control target
= control target key end

     0   :  { %s1540_s21 = smov 0   ;;  %s1695_s0 = inlined_call_operand.vmem [shape: f32[2,12,384], index: 0, kind: input, shape index: {}]   ;;  %s1696_s1 = inlined_call_operand.vmem [shape: f32[1,384], index: 1, kind: input, shape index: {}]   ;;  %s1697_s2 = inlined_call_operand.vmem [shape: f32[12,1], index: 2, kind: input, shape index: {}]   ;;  %s1698_s3 = inlined_call_operand.vmem [shape: f32[12,1], index: 3, kind: input, shape index: {}]   ;;  %s1699_s4 = inlined_call_operand.vmem [shape: bf16[9,8,12], index: 4, kind: input, shape index: {}]   ;;  %s1700_s5 = inlined_call_operand.vmem [shape: f32[8,1], index: 5, kind: input, shape index: {}]   ;;  %s1701_s6 = inlined_call_operand.vmem [shape: f32[2,8,324], index: 6, kind: output, shape index: {}]  }
   0x1 LB: > { %s1347_s22 = sadd.s32 4294967295, %s1492_s21   ;;  %p1351_p0 = scmp.ge.s32.totalorder %s1492_s21, 1  ;;  %s1492_s21 = sphi %s1540_s21, %s16_s21  }
   0x2   : > { %p212_p1 = scmp.lt.s32.totalorder %s1492_s21, 3 }
   0x4   : > { %p213_p2 = pnand %p1351_p0, %p212_p1 }
   0x5   : > { %p242_p3 = scmp.lt.s32.totalorder (!%p213_p2), %s1347_s22, 1  ;;  %s1497_s13 = smov (!%p213_p2), 127  }
   0x6   : > { %216 = sbr.rel (%p213_p2) target bundleno = 539 (0x21b), region = 44  ;;  %s1498_s14 = smov (!%p213_p2), 126  }
   0x7   : > { %s1499_s15 = smov (!%p213_p2), 110   ;;  %s1500_s16 = smov (!%p213_p2), 109  }
   0x8   : > { %s1501_s17 = smov (!%p213_p2), 108   ;;  %s1502_s18 = smov (!%p213_p2), 92  }
   0x9   : > { %s1503_s19 = smov (!%p213_p2), 91   ;;  %s1504_s20 = smov (!%p213_p2), 90  }
   0xb   : > { %v277_v0 = vld [vmem:[%s1698_s3] sm:$0xff]  ;;  %v1494_v2 = vmov 0   ;;  %v278_v3 = vld [vmem:[%s1698_s3 + $0x8] sm:$0xf]  ;;  %s1703_s22 = smov (!%p242_p3, %s1347_s22), 1  ;;  %v303_v5 = vlaneseq  ;;  %v1495_v34 = vmov 0.0  }
   0xc   : > { %v259_v1 = vld [vmem:[%s1697_s2] sm:$0xff]  ;;  %1485 = vset.pattern.permute.xlu1 %v1494_v2  ;;  %1484 = vset.pattern.permute.xlu0 %v1494_v2  ;;  %v260_v4 = vld [vmem:[%s1697_s2 + $0x8] sm:$0xf]  ;;  %s1463_s7 = smul.u32 48, %s1703_s22  ;;  %vm1496_vm0 = vmmov 0   ;;  %vm339_vm1 = vcmask 1039360  }
   0xd   : > { %281 = vperm.xlu1 %1485, %v277_v0   ;;  %263 = vperm.xlu0 %1484, %v259_v1   ;;  %v304_v6 = vshrl.u32 %v303_v5, 7  ;;  %v301_v14 = vld [vmem:[%s1696_s1] sm:$0x7]  ;;  %vm346_vm2 = vcmask 1045504   ;;  %v1354_v61 = vld [vmem:[%s1699_s4 + $0x4] sm:$0xf] }
   0xe   : > { %388 = vmatprep.mubr.bf16.mxu0 %v1494_v2  ;;  %s246_s10 = scalar_lea.vmem %s1695_s0, %s1463_s7  ;;  %1409 = vmatprep.subr.bf16.mxu1 %v1495_v34  ;;  %v1279_v52 = vld [vmem:[%s1700_s5] sm:$0xff]  ;;  %vm342_vm3 = vcmask 97280   ;;  %vm538_vm4 = vcmask 1031168   ;;  %vm645_vm5 = vcmask 900096   ;;  %vm752_vm6 = vcmask 891904  }
   0xf   : > { %v253_v7 = vld [vmem:[%s246_s10] sm:$0xff]  ;;  %v254_v8 = vld [vmem:[%s246_s10 + $0x8] sm:$0xff]  ;;  %v255_v11 = vld [vmem:[%s246_s10 + $0x10] sm:$0xff]  ;;  %v305_v15 = vsub.s32 0, %v304_v6  ;;  %v309_v17 = vsub.s32 1, %v304_v6  ;;  %v313_v24 = vsub.s32 2, %v304_v6  ;;  %1411 = vmatprep.mubr.msk.bf16.mxu1 %vm1496_vm0, %v1495_v34 }
  0x10   : > { %v256_v16 = vld [vmem:[%s246_s10 + $0x18] sm:$0xf]  ;;  %v257_v20 = vld [vmem:[%s246_s10 + $0x20] sm:$0xf]  ;;  %v258_v21 = vld [vmem:[%s246_s10 + $0x28] sm:$0xf] }
  0x11   : > { %286 = vperm.xlu1 %1485, %v278_v3   ;;  %268 = vperm.xlu0 %1484, %v260_v4   ;;  %v306_v26 = vrot.slane %v301_v14, %v305_v15  ;;  %v310_v30 = vrot.slane %v301_v14, %v309_v17  ;;  %v314_v41 = vrot.slane %v301_v14, %v313_v24  ;;  %v327_v6 = vld [vmem:[%s1699_s4] sm:$0xf]  ;;  %v1361_v15 = vld [vmem:[%s1699_s4 + $0x8] sm:$0xf]  ;;  %vm859_vm7 = vcmask 883712  }
  0x12   : > { %vm966_vm8 = vcmask 752640   ;;  %vm1073_vm9 = vcmask 744448   ;;  %vm1180_vm10 = vcmask 736256   ;;  %vm1290_vm11 = vcmask 556032  }
  0x88   : > { %v282_v9 = vpop.permute.xlu1 %281  ;;  %v264_v10 = vpop.permute.xlu0 %263 }
  0x89   : > { %v271_v12 = vmul.f32 %v264_v10, %v253_v7  ;;  %v272_v13 = vmul.f32 %v264_v10, %v254_v8  ;;  %v273_v18 = vmul.f32 %v264_v10, %v255_v11 }
  0x8b   : > { %v289_v19 = vadd.f32 %v282_v9, %v271_v12  ;;  %v290_v22 = vadd.f32 %v282_v9, %v272_v13  ;;  %v291_v31 = vadd.f32 %v282_v9, %v273_v18 }
  0x8c   : > { %v269_v23 = vpop.permute.xlu0 %268  ;;  %v287_v27 = vpop.permute.xlu1 %286 }
  0x8d   : > { %v274_v25 = vmul.f32 %v269_v23, %v256_v16  ;;  %v275_v28 = vmul.f32 %v269_v23, %v257_v20  ;;  %v276_v29 = vmul.f32 %v269_v23, %v258_v21  ;;  %v295_v32 = vmax.f32 %v289_v19, 0.0  ;;  %v1365_v23 = vld [vmem:[%s1699_s4 + $0xc] sm:$0xf] }
  0x8e   : > { %v296_v35 = vmax.f32 %v290_v22, 0.0  ;;  %v297_v42 = vmax.f32 %v291_v31, 0.0  ;;  %v1369_v31 = vld [vmem:[%s1699_s4 + $0x10] sm:$0xf] }
  0x8f   : > { %v292_v33 = vadd.f32 %v287_v27, %v274_v25  ;;  %v293_v36 = vadd.f32 %v287_v27, %v275_v28  ;;  %v294_v37 = vadd.f32 %v287_v27, %v276_v29  ;;  %v318_v43 = vmul.f32 %v306_v26, %v295_v32 }
  0x90   : > { %v319_v45 = vmul.f32 %v310_v30, %v296_v35  ;;  %v320_v50 = vmul.f32 %v314_v41, %v297_v42 }
  0x91   : > { %v298_v38 = vmax.f32 %v292_v33, 0.0  ;;  %v299_v39 = vmax.f32 %v293_v36, 0.0  ;;  %v300_v40 = vmax.f32 %v294_v37, 0.0 }
  0x93   : > { %v321_v44 = vmul.f32 %v306_v26, %v298_v38  ;;  %v322_v46 = vmul.f32 %v310_v30, %v299_v39  ;;  %v323_v47 = vmul.f32 %v314_v41, %v300_v40  ;;  %v1373_v39 = vld [vmem:[%s1699_s4 + $0x14] sm:$0xf] }
  0x95   : > { %v324_v48 = vpack.c.bf16 %v321_v44, %v318_v43  ;;  %v325_v49 = vpack.c.bf16 %v322_v46, %v319_v45  ;;  %v326_v51 = vpack.c.bf16 %v323_v47, %v320_v50  ;;  %v1377_v46 = vld [vmem:[%s1699_s4 + $0x18] sm:$0xf] }
  0x97   : > { %333 = vrot.lane.b32.xlu0 %v324_v48, %s1497_s13  ;;  %335 = vrot.lane.b32.xlu1 %v325_v49, %s1497_s13  ;;  %v447_v0 = vsel %vm346_vm2, %v326_v51, 0  ;;  %v441_v1 = vsel %vm346_vm2, %v324_v48, 0 }
  0x9b   : > { %337 = vrot.lane.b32.xlu0 %v326_v51, %s1497_s13  ;;  %532 = vrot.lane.b32.xlu1 %v324_v48, %s1498_s14 }
  0x9f   : > { %534 = vrot.lane.b32.xlu0 %v325_v49, %s1498_s14  ;;  %536 = vrot.lane.b32.xlu1 %v326_v51, %s1498_s14 }
  0xa3   : > { %639 = vrot.lane.b32.xlu0 %v324_v48, %s1499_s15  ;;  %641 = vrot.lane.b32.xlu1 %v325_v49, %s1499_s15 }
  0xa7   : > { %643 = vrot.lane.b32.xlu0 %v326_v51, %s1499_s15  ;;  %746 = vrot.lane.b32.xlu1 %v324_v48, %s1500_s16 }
  0xab   : > { %748 = vrot.lane.b32.xlu0 %v325_v49, %s1500_s16  ;;  %750 = vrot.lane.b32.xlu1 %v326_v51, %s1500_s16 }
  0xaf   : > { %853 = vrot.lane.b32.xlu0 %v324_v48, %s1501_s17  ;;  %855 = vrot.lane.b32.xlu1 %v325_v49, %s1501_s17 }
  0xb3   : > { %857 = vrot.lane.b32.xlu0 %v326_v51, %s1501_s17  ;;  %960 = vrot.lane.b32.xlu1 %v324_v48, %s1502_s18 }
  0xb7   : > { %962 = vrot.lane.b32.xlu0 %v325_v49, %s1502_s18  ;;  %964 = vrot.lane.b32.xlu1 %v326_v51, %s1502_s18 }
  0xbb   : > { %1067 = vrot.lane.b32.xlu0 %v324_v48, %s1503_s19  ;;  %1069 = vrot.lane.b32.xlu1 %v325_v49, %s1503_s19 }
  0xbf   : > { %1071 = vrot.lane.b32.xlu0 %v326_v51, %s1503_s19  ;;  %1174 = vrot.lane.b32.xlu1 %v324_v48, %s1504_s20  ;;  %s1464_s19 = smul.u32 24, %s1703_s22 }
  0xc1   : > { %s251_s24 = scalar_lea.vmem %s1701_s6, %s1464_s19 }
  0xc3   : > { %1176 = vrot.lane.b32.xlu0 %v325_v49, %s1504_s20  ;;  %1178 = vrot.lane.b32.xlu1 %v326_v51, %s1504_s20 }
  0xc7   : > { %1282 = vperm.xlu0 %1484, %v1279_v52  }
 0x109   : > { %v334_v53 = vpop.permute.xlu0 %333  ;;  %v336_v54 = vpop.permute.xlu1 %335 }
 0x10a   : > { %v340_v55 = vsel %vm339_vm1, %v334_v53, %v336_v54  ;;  %v1381_v53 = vld [vmem:[%s1699_s4 + $0x1c] sm:$0xf] }
 0x10b   : > { %v348_v60 = vsel %vm346_vm2, %v340_v55, 0 }
 0x10d   : > { %v338_v56 = vpop.permute.xlu0 %337  ;;  %v533_v57 = vpop.permute.xlu1 %532 }
 0x10e   : > { %v341_v58 = vsel %vm339_vm1, %v336_v54, %v338_v56  ;;  %v354_v59 = vsel %vm346_vm2, %v338_v56, 0 }
 0x10f   : > { %1355 = vmatprep.subr.msk.bf16.mxu0 %vm346_vm2, %v341_v58  ;;  %1410 = vmatpush3.bf16.msra.mxu1 %v354_v59 }
 0x110   : > { %371 = vmatpush1.bf16.msra.mxu0 %v348_v60  ;;  %1415 = vmatprep.subr.bf16.mxu1 %v1495_v34 }
 0x111   : > { %1358 = vmatprep.subr.msk.bf16.mxu0 %vm346_vm2, %v325_v49  ;;  %v535_v62 = vpop.permute.xlu0 %534  ;;  %v537_v63 = vpop.permute.xlu1 %536 }
 0x112   : > { %1412 = vmatmul.mubr.msk.bf16.vlgmr.msra.gmra.mxu1 %vm342_vm3, %v1354_v61  ;;  %v540_v3 = vsel %vm538_vm4, %v535_v62, %v537_v63  ;;  %v539_v7 = vsel %vm538_vm4, %v533_v57, %v535_v62  ;;  %v551_v9 = vsel %vm346_vm2, %v537_v63, 0  ;;  %v1385_v57 = vld [vmem:[%s1699_s4 + $0x20] sm:$0xf] }
 0x113   : > { %1356 = vmatmul.mubr.msk.bf16.vlgmr.msra.gmra.mxu0 %vm342_vm3, %v1354_v61  ;;  %1416 = vmatpush3.bf16.msra.mxu1 %v447_v0  ;;  %v545_v12 = vsel %vm346_vm2, %v539_v7, 0 }
 0x114   : > { %464 = vmatpush1.bf16.msra.mxu0 %v441_v1  ;;  %1417 = vmatprep.mubr.msk.bf16.mxu1 %vm1496_vm0, %v1495_v34 }
 0x115   : > { %v640_v4 = vpop.permute.xlu0 %639  ;;  %1362 = vmatprep.subr.msk.bf16.mxu0 %vm346_vm2, %v540_v3  ;;  %1421 = vmatprep.subr.bf16.mxu1 %v1495_v34  ;;  %v642_v5 = vpop.permute.xlu1 %641 }
 0x116   : > { %481 = vmatprep.mubr.bf16.mxu0 %v1494_v2  ;;  %v646_v16 = vsel %vm645_vm5, %v640_v4, %v642_v5 }
 0x117   : > { %v652_v19 = vsel %vm346_vm2, %v646_v16, 0 }
 0x119   : > { %v644_v8 = vpop.permute.xlu0 %643  ;;  %v747_v10 = vpop.permute.xlu1 %746 }
 0x11a   : > { %v647_v11 = vsel %vm645_vm5, %v642_v5, %v644_v8  ;;  %1418 = vmatmul.mubr.msk.bf16.vlgmr.msra.gmra.mxu1 %vm342_vm3, %v327_v6  ;;  %v658_v18 = vsel %vm346_vm2, %v644_v8, 0 }
 0x11b   : > { %1422 = vmatpush3.bf16.msra.mxu1 %v551_v9  ;;  %1359 = vmatmul.mubr.msk.bf16.vlgmr.msra.gmra.mxu0 %vm342_vm3, %v327_v6 }
 0x11c   : > { %568 = vmatpush1.bf16.msra.mxu0 %v545_v12  ;;  %1423 = vmatprep.mubr.msk.bf16.mxu1 %vm1496_vm0, %v1495_v34 }
 0x11d   : > { %1366 = vmatprep.subr.msk.bf16.mxu0 %vm346_vm2, %v647_v11  ;;  %v749_v13 = vpop.permute.xlu0 %748  ;;  %1427 = vmatprep.subr.bf16.mxu1 %v1495_v34  ;;  %v751_v14 = vpop.permute.xlu1 %750 }
 0x11e   : > { %585 = vmatprep.mubr.bf16.mxu0 %v1494_v2  ;;  %v754_v21 = vsel %vm752_vm6, %v749_v13, %v751_v14  ;;  %v753_v24 = vsel %vm752_vm6, %v747_v10, %v749_v13  ;;  %v765_v26 = vsel %vm346_vm2, %v751_v14, 0 }
 0x11f   : > { %v759_v27 = vsel %vm346_vm2, %v753_v24, 0 }
 0x121   : > { %v854_v17 = vpop.permute.xlu0 %853  ;;  %v856_v20 = vpop.permute.xlu1 %855 }
 0x122   : > { %1424 = vmatmul.mubr.msk.bf16.vlgmr.msra.gmra.mxu1 %vm342_vm3, %v1361_v15  ;;  %v860_v32 = vsel %vm859_vm7, %v854_v17, %v856_v20 }
 0x123   : > { %1428 = vmatpush3.bf16.msra.mxu1 %v658_v18  ;;  %1363 = vmatmul.mubr.msk.bf16.vlgmr.msra.gmra.mxu0 %vm342_vm3, %v1361_v15  ;;  %v866_v35 = vsel %vm346_vm2, %v860_v32, 0 }
 0x124   : > { %675 = vmatpush1.bf16.msra.mxu0 %v652_v19  ;;  %1429 = vmatprep.mubr.msk.bf16.mxu1 %vm1496_vm0, %v1495_v34 }
 0x125   : > { %1370 = vmatprep.subr.msk.bf16.mxu0 %vm346_vm2, %v754_v21  ;;  %1433 = vmatprep.subr.bf16.mxu1 %v1495_v34  ;;  %v858_v22 = vpop.permute.xlu0 %857  ;;  %v961_v25 = vpop.permute.xlu1 %960 }
 0x126   : > { %692 = vmatprep.mubr.bf16.mxu0 %v1494_v2  ;;  %v861_v28 = vsel %vm859_vm7, %v856_v20, %v858_v22  ;;  %v872_v33 = vsel %vm346_vm2, %v858_v22, 0 }
 0x129   : > { %v963_v29 = vpop.permute.xlu0 %962  ;;  %v965_v30 = vpop.permute.xlu1 %964 }
 0x12a   : > { %1430 = vmatmul.mubr.msk.bf16.vlgmr.msra.gmra.mxu1 %vm342_vm3, %v1365_v23  ;;  %v968_v37 = vsel %vm966_vm8, %v963_v29, %v965_v30  ;;  %v967_v40 = vsel %vm966_vm8, %v961_v25, %v963_v29  ;;  %v979_v42 = vsel %vm346_vm2, %v965_v30, 0 }
 0x12b   : > { %1434 = vmatpush3.bf16.msra.mxu1 %v765_v26  ;;  %1367 = vmatmul.mubr.msk.bf16.vlgmr.msra.gmra.mxu0 %vm342_vm3, %v1365_v23  ;;  %v973_v43 = vsel %vm346_vm2, %v967_v40, 0 }
 0x12c   : > { %782 = vmatpush1.bf16.msra.mxu0 %v759_v27  ;;  %1435 = vmatprep.mubr.msk.bf16.mxu1 %vm1496_vm0, %v1495_v34 }
 0x12d   : > { %1374 = vmatprep.subr.msk.bf16.mxu0 %vm346_vm2, %v861_v28  ;;  %1439 = vmatprep.subr.bf16.mxu1 %v1495_v34  ;;  %v1068_v36 = vpop.permute.xlu0 %1067  ;;  %v1070_v38 = vpop.permute.xlu1 %1069 }
 0x12e   : > { %799 = vmatprep.mubr.bf16.mxu0 %v1494_v2  ;;  %v1074_v47 = vsel %vm1073_vm9, %v1068_v36, %v1070_v38 }
 0x12f   : > { %v1080_v51 = vsel %vm346_vm2, %v1074_v47, 0 }
 0x131   : > { %v1072_v41 = vpop.permute.xlu0 %1071  ;;  %v1175_v44 = vpop.permute.xlu1 %1174 }
 0x132   : > { %1436 = vmatmul.mubr.msk.bf16.vlgmr.msra.gmra.mxu1 %vm342_vm3, %v1369_v31  ;;  %v1075_v45 = vsel %vm1073_vm9, %v1070_v38, %v1072_v41  ;;  %v1086_v50 = vsel %vm346_vm2, %v1072_v41, 0 }
 0x133   : > { %1440 = vmatpush3.bf16.msra.mxu1 %v872_v33  ;;  %1371 = vmatmul.mubr.msk.bf16.vlgmr.msra.gmra.mxu0 %vm342_vm3, %v1369_v31 }
 0x134   : > { %889 = vmatpush1.bf16.msra.mxu0 %v866_v35  ;;  %1441 = vmatprep.mubr.msk.bf16.mxu1 %vm1496_vm0, %v1495_v34 }
 0x135   : > { %1378 = vmatprep.subr.msk.bf16.mxu0 %vm346_vm2, %v968_v37  ;;  %1445 = vmatprep.subr.bf16.mxu1 %v1495_v34  ;;  %v1179_v48 = vpop.permute.xlu1 %1178  ;;  %v1177_v49 = vpop.permute.xlu0 %1176 }
 0x136   : > { %906 = vmatprep.mubr.bf16.mxu0 %v1494_v2  ;;  %v1182_v52 = vsel %vm1180_vm10, %v1177_v49, %v1179_v48  ;;  %v1181_v54 = vsel %vm1180_vm10, %v1175_v44, %v1177_v49  ;;  %v1193_v55 = vsel %vm346_vm2, %v1179_v48, 0 }
 0x137   : > { %v1187_v56 = vsel %vm346_vm2, %v1181_v54, 0 }
 0x13a   : > { %1442 = vmatmul.mubr.msk.bf16.vlgmr.msra.gmra.mxu1 %vm342_vm3, %v1373_v39 }
 0x13b   : > { %1446 = vmatpush3.bf16.msra.mxu1 %v979_v42  ;;  %1375 = vmatmul.mubr.msk.bf16.vlgmr.msra.gmra.mxu0 %vm342_vm3, %v1373_v39 }
 0x13c   : > { %996 = vmatpush1.bf16.msra.mxu0 %v973_v43  ;;  %1447 = vmatprep.mubr.msk.bf16.mxu1 %vm1496_vm0, %v1495_v34 }
 0x13d   : > { %1382 = vmatprep.subr.msk.bf16.mxu0 %vm346_vm2, %v1075_v45  ;;  %1451 = vmatprep.subr.bf16.mxu1 %v1495_v34 }
 0x13e   : > { %1013 = vmatprep.mubr.bf16.mxu0 %v1494_v2 }
 0x142   : > { %1448 = vmatmul.mubr.msk.bf16.vlgmr.msra.gmra.mxu1 %vm342_vm3, %v1377_v46 }
 0x143   : > { %1452 = vmatpush3.bf16.msra.mxu1 %v1086_v50  ;;  %1379 = vmatmul.mubr.msk.bf16.vlgmr.msra.gmra.mxu0 %vm342_vm3, %v1377_v46 }
 0x144   : > { %1103 = vmatpush1.bf16.msra.mxu0 %v1080_v51  ;;  %1453 = vmatprep.mubr.msk.bf16.mxu1 %vm1496_vm0, %v1495_v34 }
 0x145   : > { %1386 = vmatprep.subr.msk.bf16.mxu0 %vm346_vm2, %v1182_v52  ;;  %1457 = vmatprep.subr.bf16.mxu1 %v1495_v34 }
 0x146   : > { %1120 = vmatprep.mubr.bf16.mxu0 %v1494_v2 }
 0x14a   : > { %1454 = vmatmul.mubr.msk.bf16.vlgmr.msra.gmra.mxu1 %vm342_vm3, %v1381_v53 }
 0x14b   : > { %1458 = vmatpush3.bf16.msra.mxu1 %v1193_v55  ;;  %1383 = vmatmul.mubr.msk.bf16.vlgmr.msra.gmra.mxu0 %vm342_vm3, %v1381_v53 }
 0x14c   : > { %1210 = vmatpush1.bf16.msra.mxu0 %v1187_v56  ;;  %1459 = vmatprep.mubr.msk.bf16.mxu1 %vm1496_vm0, %v1495_v34 }
 0x14d   : > { %1227 = vmatprep.mubr.bf16.mxu0 %v1494_v2 }
 0x152   : > { %1460 = vmatmul.mubr.msk.bf16.vlgmr.msra.gmra.mxu1 %vm342_vm3, %v1385_v57 }
 0x153   : > { %1387 = vmatmul.mubr.msk.bf16.vlgmr.msra.gmra.mxu0 %vm342_vm3, %v1385_v57 }
 0x1d2   : > { %v431_v58 = vpop.f32.mrf.mxu1 }
 0x1d3   : > { %v390_v59 = vpop.f32.mrf.mxu0 }
 0x1d4   : > { %v1413_v60 = vpop.f32.mrf.mxu1 }
 0x1d5   : > { %v392_v61 = vpop.f32.mrf.mxu0 }
 0x1d6   : > { %v434_v62 = vpop.f32.mrf.mxu1 }
 0x1d7   : > { %v394_v63 = vpop.f32.mrf.mxu0 }
 0x1d8   : > { %v1414_v0 = vpop.f32.mrf.mxu1 }
 0x1d9   : > { %v395_v1 = vpop.f32.mrf.mxu0 }
 0x1da   : > { %v524_v3 = vpop.f32.mrf.mxu1 }
 0x1db   : > { %v483_v34 = vpop.f32.mrf.mxu0  ;;  %v525_v45 = vadd.f32 %v524_v3, %v431_v58 }
 0x1dc   : > { %v1419_v4 = vpop.f32.mrf.mxu1  ;;  %v484_v47 = vadd.f32 %v483_v34, %v390_v59 }
 0x1dd   : > { %v485_v2 = vpop.f32.mrf.mxu0 }
 0x1de   : > { %v527_v5 = vpop.f32.mrf.mxu1  ;;  %v486_v51 = vadd.f32 %v485_v2, %v392_v61 }
 0x1df   : > { %v487_v6 = vpop.f32.mrf.mxu0 }
 0x1e0   : > { %v1420_v7 = vpop.f32.mrf.mxu1 }
 0x1e1   : > { %v488_v8 = vpop.f32.mrf.mxu0 }
 0x1e2   : > { %v628_v9 = vpop.f32.mrf.mxu1 }
 0x1e3   : > { %v587_v10 = vpop.f32.mrf.mxu0  ;;  %v636_v49 = vadd.f32 %v628_v9, %v525_v45 }
 0x1e4   : > { %v1425_v11 = vpop.f32.mrf.mxu1  ;;  %v634_v52 = vadd.f32 %v587_v10, %v484_v47 }
 0x1e5   : > { %v589_v12 = vpop.f32.mrf.mxu0 }
 0x1e6   : > { %v631_v13 = vpop.f32.mrf.mxu1  ;;  %v635_v56 = vadd.f32 %v589_v12, %v486_v51 }
 0x1e7   : > { %v591_v14 = vpop.f32.mrf.mxu0 }
 0x1e8   : > { %v1426_v15 = vpop.f32.mrf.mxu1 }
 0x1e9   : > { %v592_v16 = vpop.f32.mrf.mxu0 }
 0x1ea   : > { %v735_v17 = vpop.f32.mrf.mxu1  ;;  %v1283_v16 = vpop.permute.xlu0 %1282 }
 0x1eb   : > { %v694_v18 = vpop.f32.mrf.mxu0  ;;  %v743_v54 = vadd.f32 %v735_v17, %v636_v49 }
 0x1ec   : > { %v1431_v19 = vpop.f32.mrf.mxu1  ;;  %v741_v57 = vadd.f32 %v694_v18, %v634_v52 }
 0x1ed   : > { %v696_v20 = vpop.f32.mrf.mxu0 }
 0x1ee   : > { %v738_v21 = vpop.f32.mrf.mxu1  ;;  %v742_v0 = vadd.f32 %v696_v20, %v635_v56 }
 0x1ef   : > { %v698_v22 = vpop.f32.mrf.mxu0 }
 0x1f0   : > { %v1432_v23 = vpop.f32.mrf.mxu1 }
 0x1f1   : > { %v699_v24 = vpop.f32.mrf.mxu0 }
 0x1f2   : > { %v842_v25 = vpop.f32.mrf.mxu1 }
 0x1f3   : > { %v801_v26 = vpop.f32.mrf.mxu0  ;;  %v850_v62 = vadd.f32 %v842_v25, %v743_v54 }
 0x1f4   : > { %v1437_v27 = vpop.f32.mrf.mxu1  ;;  %v848_v1 = vadd.f32 %v801_v26, %v741_v57 }
 0x1f5   : > { %v803_v28 = vpop.f32.mrf.mxu0 }
 0x1f6   : > { %v845_v29 = vpop.f32.mrf.mxu1  ;;  %v849_v59 = vadd.f32 %v803_v28, %v742_v0 }
 0x1f7   : > { %v805_v30 = vpop.f32.mrf.mxu0 }
 0x1f8   : > { %v1438_v31 = vpop.f32.mrf.mxu1 }
 0x1f9   : > { %v806_v32 = vpop.f32.mrf.mxu0 }
 0x1fa   : > { %v949_v33 = vpop.f32.mrf.mxu1 }
 0x1fb   : > { %v908_v35 = vpop.f32.mrf.mxu0  ;;  %v957_v58 = vadd.f32 %v949_v33, %v850_v62 }
 0x1fc   : > { %v1443_v36 = vpop.f32.mrf.mxu1  ;;  %v955_v34 = vadd.f32 %v908_v35, %v848_v1 }
 0x1fd   : > { %v910_v37 = vpop.f32.mrf.mxu0 }
 0x1fe   : > { %v952_v38 = vpop.f32.mrf.mxu1  ;;  %v956_v2 = vadd.f32 %v910_v37, %v849_v59 }
 0x1ff   : > { %v912_v39 = vpop.f32.mrf.mxu0 }
 0x200   : > { %v1444_v40 = vpop.f32.mrf.mxu1 }
 0x201   : > { %v913_v41 = vpop.f32.mrf.mxu0 }
 0x202   : > { %v1056_v42 = vpop.f32.mrf.mxu1 }
 0x203   : > { %v1015_v43 = vpop.f32.mrf.mxu0  ;;  %v1064_v6 = vadd.f32 %v1056_v42, %v957_v58 }
 0x204   : > { %v1449_v44 = vpop.f32.mrf.mxu1  ;;  %v1062_v7 = vadd.f32 %v1015_v43, %v955_v34 }
 0x205   : > { %v1017_v46 = vpop.f32.mrf.mxu0 }
 0x206   : > { %v1059_v48 = vpop.f32.mrf.mxu1  ;;  %v1063_v11 = vadd.f32 %v1017_v46, %v956_v2 }
 0x207   : > { %v1019_v50 = vpop.f32.mrf.mxu0 }
 0x208   : > { %v1450_v53 = vpop.f32.mrf.mxu1 }
 0x209   : > { %v1020_v55 = vpop.f32.mrf.mxu0 }
 0x20a   : > { %v1163_v60 = vpop.f32.mrf.mxu1 }
 0x20b   : > { %v1122_v63 = vpop.f32.mrf.mxu0  ;;  %v1171_v9 = vadd.f32 %v1163_v60, %v1064_v6 }
 0x20c   : > { %v1455_v4 = vpop.f32.mrf.mxu1  ;;  %v1169_v12 = vadd.f32 %v1122_v63, %v1062_v7 }
 0x20d   : > { %v1124_v3 = vpop.f32.mrf.mxu0 }
 0x20e   : > { %v1166_v5 = vpop.f32.mrf.mxu1  ;;  %v1170_v17 = vadd.f32 %v1124_v3, %v1063_v11 }
 0x20f   : > { %v1126_v61 = vpop.f32.mrf.mxu0 }
 0x210   : > { %v1456_v8 = vpop.f32.mrf.mxu1 }
 0x211   : > { %v1127_v10 = vpop.f32.mrf.mxu0 }
 0x212   : > { %v1270_v13 = vpop.f32.mrf.mxu1 }
 0x213   : > { %v1278_v14 = vadd.f32 %v1270_v13, %v1171_v9  ;;  %v1229_v15 = vpop.f32.mrf.mxu0 }
 0x214   : > { %v1276_v18 = vadd.f32 %v1229_v15, %v1169_v12  ;;  %v1461_v19 = vpop.f32.mrf.mxu1 }
 0x215   : > { %v1287_v20 = vadd.f32 %v1283_v16, %v1278_v14  ;;  %v1231_v21 = vpop.f32.mrf.mxu0 }
 0x216   : > { %v1285_v22 = vadd.f32 %v1283_v16, %v1276_v18  ;;  %v1277_v23 = vadd.f32 %v1231_v21, %v1170_v17  ;;  %v1273_v24 = vpop.f32.mrf.mxu1 }
 0x217   : > { %1291 = vst.msk [vmem:[%s251_s24 + $0x10] sm:$0xff] %vm1290_vm11, %v1287_v20  ;;  %v1233_v25 = vpop.f32.mrf.mxu0 }
 0x218   : > { %1288 = vst [vmem:[%s251_s24] sm:$0xff] %v1285_v22  ;;  %v1286_v26 = vadd.f32 %v1283_v16, %v1277_v23  ;;  %v1462_v27 = vpop.f32.mrf.mxu1 }
 0x219   : > { %v1234_v28 = vpop.f32.mrf.mxu0 }
 0x21a   : > { %1289 = vst [vmem:[%s251_s24 + $0x8] sm:$0xff] %v1286_v26 }
 0x21b PF: > { %s16_s21 = sadd.s32 1, %s1492_s21  }
 0x21c   : > { %p13_p4 = scmp.ge.s32.totalorder %s16_s21, 4  }
 0x21e   :  { %15 = sbr.rel (!%p13_p4) target bundleno = 1 (0x1), region = 82 }

// kernel: dense_block_forward.5
= control target key start
LH: loop header
LB: loop body
LE: loop exit
PB: predicated region body
PF: predicated region fallthrough
CT: control target
= control target key end

     0   :  { %s1688_s21 = smov 0   ;;  %s1950_s0 = inlined_call_operand.vmem [shape: f32[2,20,384], index: 0, kind: input, shape index: {}]   ;;  %s1951_s1 = inlined_call_operand.vmem [shape: f32[1,384], index: 1, kind: input, shape index: {}]   ;;  %s1952_s2 = inlined_call_operand.vmem [shape: f32[20,1], index: 2, kind: input, shape index: {}]   ;;  %s1953_s3 = inlined_call_operand.vmem [shape: f32[20,1], index: 3, kind: input, shape index: {}]   ;;  %s1954_s4 = inlined_call_operand.vmem [shape: bf16[9,8,20], index: 4, kind: input, shape index: {}]   ;;  %s1955_s5 = inlined_call_operand.vmem [shape: f32[8,1], index: 5, kind: input, shape index: {}]   ;;  %s1956_s6 = inlined_call_operand.vmem [shape: f32[2,8,324], index: 6, kind: output, shape index: {}]  }
   0x1 LB: > { %s1468_s22 = sadd.s32 4294967295, %s1640_s21   ;;  %p1472_p0 = scmp.ge.s32.totalorder %s1640_s21, 1  ;;  %s1640_s21 = sphi %s1688_s21, %s16_s21  }
   0x2   : > { %p212_p1 = scmp.lt.s32.totalorder %s1640_s21, 3 }
   0x4   : > { %p213_p2 = pnand %p1472_p0, %p212_p1 }
   0x5   : > { %p242_p3 = scmp.lt.s32.totalorder (!%p213_p2), %s1468_s22, 1  ;;  %s1644_s17 = smov (!%p213_p2), 127  }
   0x6   : > { %216 = sbr.rel (%p213_p2) target bundleno = 561 (0x231), region = 44  ;;  %s1646_s18 = smov (!%p213_p2), 126  }
   0x7   : > { %s1647_s19 = smov (!%p213_p2), 110   ;;  %s1648_s20 = smov (!%p213_p2), 109  }
   0x8   : > { %s1649_s23 = smov (!%p213_p2), 108   ;;  %s1650_s24 = smov (!%p213_p2), 92  }
   0x9   : > { %s1651_s25 = smov (!%p213_p2), 91   ;;  %s1652_s26 = smov (!%p213_p2), 90  }
   0xb   : > { %v264_v0 = vld [vmem:[%s1952_s2 + $0x10] sm:$0xf]  ;;  %v262_v1 = vld [vmem:[%s1952_s2] sm:$0xff]  ;;  %v1642_v2 = vmov 0   ;;  %v263_v4 = vld [vmem:[%s1952_s2 + $0x8] sm:$0xff]  ;;  %s1958_s22 = smov (!%p242_p3, %s1468_s22), 1  ;;  %v327_v7 = vlaneseq }
   0xc   : > { %1633 = vset.pattern.permute.xlu1 %v1642_v2  ;;  %1632 = vset.pattern.permute.xlu0 %v1642_v2  ;;  %v291_v3 = vld [vmem:[%s1953_s3 + $0x10] sm:$0xf]  ;;  %v289_v5 = vld [vmem:[%s1953_s3] sm:$0xff]  ;;  %v290_v6 = vld [vmem:[%s1953_s3 + $0x8] sm:$0xff]  ;;  %s1611_s11 = smul.u32 72, %s1958_s22  ;;  %v1643_v39 = vmov 0.0  }
   0xd   : > { %277 = vperm.xlu0 %1632, %v264_v0   ;;  %267 = vperm.xlu1 %1633, %v262_v1   ;;  %v328_v8 = vshrl.u32 %v327_v7, 7  ;;  %v325_v15 = vld [vmem:[%s1951_s1] sm:$0x7]  ;;  %vm1645_vm0 = vmmov 0   ;;  %vm378_vm1 = vcmask 1039360   ;;  %vm390_vm2 = vcmask 1041408  }
   0xe   : > { %432 = vmatprep.mubr.bf16.mxu0 %v1642_v2  ;;  %s246_s14 = scalar_lea.vmem %s1950_s0, %s1611_s11  ;;  %1539 = vmatprep.subr.bf16.mxu1 %v1643_v39  ;;  %vm386_vm3 = vcmask 162816   ;;  %vm588_vm4 = vcmask 1031168   ;;  %vm706_vm5 = vcmask 900096   ;;  %vm824_vm6 = vcmask 891904  }
   0xf   : > { %v329_v9 = vsub.s32 0, %v328_v8  ;;  %v259_v11 = vld [vmem:[%s246_s14 + $0x30] sm:$0xf]  ;;  %v260_v12 = vld [vmem:[%s246_s14 + $0x38] sm:$0xf]  ;;  %v333_v16 = vsub.s32 1, %v328_v8  ;;  %1543 = vmatprep.mubr.msk.bf16.mxu1 %vm1645_vm0, %v1643_v39 }
  0x10   : > { %v261_v13 = vld [vmem:[%s246_s14 + $0x40] sm:$0xf]  ;;  %v337_v17 = vsub.s32 2, %v328_v8  ;;  %v254_v22 = vld [vmem:[%s246_s14 + $0x8] sm:$0xff]  ;;  %v255_v26 = vld [vmem:[%s246_s14 + $0x10] sm:$0xff]  ;;  %vm942_vm7 = vcmask 883712  }
  0x11   : > { %304 = vperm.xlu0 %1632, %v291_v3   ;;  %272 = vperm.xlu1 %1633, %v263_v4   ;;  %v253_v21 = vld [vmem:[%s246_s14] sm:$0xff]  ;;  %v330_v23 = vrot.slane %v325_v15, %v329_v9  ;;  %v334_v27 = vrot.slane %v325_v15, %v333_v16  ;;  %v256_v31 = vld [vmem:[%s246_s14 + $0x18] sm:$0xff]  ;;  %v258_v34 = vld [vmem:[%s246_s14 + $0x28] sm:$0xff]  ;;  %vm1060_vm8 = vcmask 752640   ;;  %vm1178_vm9 = vcmask 744448  }
  0x12   : > { %v257_v32 = vld [vmem:[%s246_s14 + $0x20] sm:$0xff]  ;;  %v338_v33 = vrot.slane %v325_v15, %v337_v17  ;;  %vm1296_vm10 = vcmask 736256   ;;  %vm1411_vm11 = vcmask 556032  }
  0x15   : > { %294 = vperm.xlu0 %1632, %v289_v5   ;;  %299 = vperm.xlu1 %1633, %v290_v6  }
  0x88   : > { %v278_v10 = vpop.permute.xlu0 %277  ;;  %v268_v14 = vpop.permute.xlu1 %267 }
  0x89   : > { %v286_v18 = vmul.f32 %v278_v10, %v259_v11  ;;  %v287_v19 = vmul.f32 %v278_v10, %v260_v12  ;;  %v288_v20 = vmul.f32 %v278_v10, %v261_v13  ;;  %v280_v35 = vmul.f32 %v268_v14, %v253_v21  ;;  %v1400_v11 = vld [vmem:[%s1955_s5] sm:$0xff] }
  0x8a   : > { %v281_v40 = vmul.f32 %v268_v14, %v254_v22  ;;  %v282_v41 = vmul.f32 %v268_v14, %v255_v26 }
  0x8c   : > { %v305_v24 = vpop.permute.xlu0 %304  ;;  %v273_v25 = vpop.permute.xlu1 %272 }
  0x8d   : > { %v313_v28 = vadd.f32 %v305_v24, %v286_v18  ;;  %v314_v29 = vadd.f32 %v305_v24, %v287_v19  ;;  %v315_v30 = vadd.f32 %v305_v24, %v288_v20  ;;  %v283_v42 = vmul.f32 %v273_v25, %v256_v31  ;;  %v357_v31 = vld [vmem:[%s1954_s4] sm:$0xf] }
  0x8e   : > { %v284_v43 = vmul.f32 %v273_v25, %v257_v32  ;;  %v285_v48 = vmul.f32 %v273_v25, %v258_v34 }
  0x8f   : > { %v322_v36 = vmax.f32 %v313_v28, 0.0  ;;  %v323_v37 = vmax.f32 %v314_v29, 0.0  ;;  %v324_v38 = vmax.f32 %v315_v30, 0.0 }
  0x90   : > { %v295_v44 = vpop.permute.xlu0 %294  ;;  %v300_v45 = vpop.permute.xlu1 %299 }
  0x91   : > { %v348_v46 = vmul.f32 %v330_v23, %v322_v36  ;;  %v349_v47 = vmul.f32 %v334_v27, %v323_v37  ;;  %v307_v49 = vadd.f32 %v295_v44, %v280_v35  ;;  %v308_v50 = vadd.f32 %v295_v44, %v281_v40 }
  0x92   : > { %v309_v51 = vadd.f32 %v295_v44, %v282_v41  ;;  %v310_v52 = vadd.f32 %v300_v45, %v283_v42  ;;  %v311_v53 = vadd.f32 %v300_v45, %v284_v43  ;;  %v350_v54 = vmul.f32 %v338_v33, %v324_v38  ;;  %v1482_v42 = vld [vmem:[%s1954_s4 + $0x8] sm:$0xf] }
  0x93   : > { %v1727_v55 = vpack.c.bf16 %v348_v46, %v348_v46  ;;  %v1729_v56 = vpack.c.bf16 %v349_v47, %v349_v47  ;;  %v317_v57 = vmax.f32 %v308_v50, 0.0  ;;  %v312_v59 = vadd.f32 %v300_v45, %v285_v48 }
  0x94   : > { %v318_v58 = vmax.f32 %v309_v51, 0.0  ;;  %v316_v60 = vmax.f32 %v307_v49, 0.0  ;;  %v319_v61 = vmax.f32 %v310_v52, 0.0  ;;  %v320_v62 = vmax.f32 %v311_v53, 0.0  ;;  %v1486_v53 = vld [vmem:[%s1954_s4 + $0xc] sm:$0xf] }
  0x95   : > { %374 = vrot.lane.b32.xlu1 %v1729_v56, %s1644_s17  ;;  %372 = vrot.lane.b32.xlu0 %v1727_v55, %s1644_s17  ;;  %v343_v63 = vmul.f32 %v334_v27, %v317_v57  ;;  %v321_v0 = vmax.f32 %v312_v59, 0.0  ;;  %v1733_v1 = vpack.c.bf16 %v350_v54, %v350_v54  ;;  %v485_v28 = vsel %vm390_vm2, %v1727_v55, 0 }
  0x96   : > { %v344_v3 = vmul.f32 %v338_v33, %v318_v58  ;;  %v346_v4 = vmul.f32 %v334_v27, %v320_v62  ;;  %v342_v6 = vmul.f32 %v330_v23, %v316_v60  ;;  %v345_v7 = vmul.f32 %v330_v23, %v319_v61  ;;  %v1475_v23 = vld [vmem:[%s1954_s4 + $0x4] sm:$0xf] }
  0x97   : > { %v347_v5 = vmul.f32 %v338_v33, %v321_v0  ;;  %v491_v26 = vsel %vm390_vm2, %v1733_v1, 0 }
  0x98   : > { %v1737_v8 = vpack.c.bf16 %v346_v4, %v343_v63  ;;  %v1743_v10 = vpack.c.bf16 %v345_v7, %v342_v6 }
  0x99   : > { %376 = vrot.lane.b32.xlu0 %v1733_v1, %s1644_s17  ;;  %v1740_v9 = vpack.c.bf16 %v347_v5, %v344_v3  ;;  %v1490_v3 = vld [vmem:[%s1954_s4 + $0x10] sm:$0xf] }
  0x9a   : > { %368 = vrot.lane.b32.xlu1 %v1737_v8, %s1644_s17 }
  0x9d   : > { %370 = vrot.lane.b32.xlu0 %v1740_v9, %s1644_s17 }
  0x9e   : > { %366 = vrot.lane.b32.xlu1 %v1743_v10, %s1644_s17 }
  0xa1   : > { %582 = vrot.lane.b32.xlu0 %v1727_v55, %s1646_s18 }
  0xa2   : > { %584 = vrot.lane.b32.xlu1 %v1729_v56, %s1646_s18 }
  0xa5   : > { %586 = vrot.lane.b32.xlu0 %v1733_v1, %s1646_s18 }
  0xa6   : > { %578 = vrot.lane.b32.xlu1 %v1737_v8, %s1646_s18 }
  0xa9   : > { %580 = vrot.lane.b32.xlu0 %v1740_v9, %s1646_s18 }
  0xaa   : > { %576 = vrot.lane.b32.xlu1 %v1743_v10, %s1646_s18 }
  0xad   : > { %700 = vrot.lane.b32.xlu0 %v1727_v55, %s1647_s19 }
  0xae   : > { %702 = vrot.lane.b32.xlu1 %v1729_v56, %s1647_s19 }
  0xb1   : > { %704 = vrot.lane.b32.xlu0 %v1733_v1, %s1647_s19 }
  0xb2   : > { %696 = vrot.lane.b32.xlu1 %v1737_v8, %s1647_s19 }
  0xb5   : > { %698 = vrot.lane.b32.xlu0 %v1740_v9, %s1647_s19 }
  0xb6   : > { %694 = vrot.lane.b32.xlu1 %v1743_v10, %s1647_s19 }
  0xb9   : > { %818 = vrot.lane.b32.xlu0 %v1727_v55, %s1648_s20 }
  0xba   : > { %820 = vrot.lane.b32.xlu1 %v1729_v56, %s1648_s20 }
  0xbd   : > { %822 = vrot.lane.b32.xlu0 %v1733_v1, %s1648_s20 }
  0xbe   : > { %814 = vrot.lane.b32.xlu1 %v1737_v8, %s1648_s20 }
  0xc1   : > { %816 = vrot.lane.b32.xlu0 %v1740_v9, %s1648_s20 }
  0xc2   : > { %812 = vrot.lane.b32.xlu1 %v1743_v10, %s1648_s20 }
  0xc5   : > { %936 = vrot.lane.b32.xlu0 %v1727_v55, %s1649_s23 }
  0xc6   : > { %938 = vrot.lane.b32.xlu1 %v1729_v56, %s1649_s23 }
  0xc9   : > { %940 = vrot.lane.b32.xlu0 %v1733_v1, %s1649_s23 }
  0xca   : > { %932 = vrot.lane.b32.xlu1 %v1737_v8, %s1649_s23 }
  0xcd   : > { %934 = vrot.lane.b32.xlu0 %v1740_v9, %s1649_s23 }
  0xce   : > { %930 = vrot.lane.b32.xlu1 %v1743_v10, %s1649_s23 }
  0xd1   : > { %1054 = vrot.lane.b32.xlu0 %v1727_v55, %s1650_s24 }
  0xd2   : > { %1056 = vrot.lane.b32.xlu1 %v1729_v56, %s1650_s24 }
  0xd5   : > { %1058 = vrot.lane.b32.xlu0 %v1733_v1, %s1650_s24 }
  0xd6   : > { %1050 = vrot.lane.b32.xlu1 %v1737_v8, %s1650_s24 }
  0xd9   : > { %1052 = vrot.lane.b32.xlu0 %v1740_v9, %s1650_s24 }
  0xda   : > { %1048 = vrot.lane.b32.xlu1 %v1743_v10, %s1650_s24 }
  0xdd   : > { %1172 = vrot.lane.b32.xlu0 %v1727_v55, %s1651_s25 }
  0xde   : > { %1174 = vrot.lane.b32.xlu1 %v1729_v56, %s1651_s25 }
  0xe1   : > { %1176 = vrot.lane.b32.xlu0 %v1733_v1, %s1651_s25 }
  0xe2   : > { %1168 = vrot.lane.b32.xlu1 %v1737_v8, %s1651_s25 }
  0xe5   : > { %1170 = vrot.lane.b32.xlu0 %v1740_v9, %s1651_s25 }
  0xe6   : > { %1166 = vrot.lane.b32.xlu1 %v1743_v10, %s1651_s25  ;;  %s1612_s25 = smul.u32 24, %s1958_s22 }
  0xe8   : > { %s251_s28 = scalar_lea.vmem %s1956_s6, %s1612_s25 }
  0xe9   : > { %1290 = vrot.lane.b32.xlu0 %v1727_v55, %s1652_s26 }
  0xea   : > { %1292 = vrot.lane.b32.xlu1 %v1729_v56, %s1652_s26 }
  0xed   : > { %1294 = vrot.lane.b32.xlu0 %v1733_v1, %s1652_s26 }
  0xee   : > { %1286 = vrot.lane.b32.xlu1 %v1737_v8, %s1652_s26 }
  0xf1   : > { %1288 = vrot.lane.b32.xlu0 %v1740_v9, %s1652_s26 }
  0xf2   : > { %1284 = vrot.lane.b32.xlu1 %v1743_v10, %s1652_s26 }
  0xf5   : > { %1403 = vperm.xlu0 %1632, %v1400_v11  }
 0x107   : > { %v375_v12 = vpop.permute.xlu1 %374  ;;  %v373_v13 = vpop.permute.xlu0 %372 }
 0x108   : > { %v381_v14 = vsel %vm378_vm1, %v373_v13, %v375_v12 }
 0x109   : > { %v392_v19 = vsel %vm390_vm2, %v381_v14, 0 }
 0x10b   : > { %v377_v15 = vpop.permute.xlu0 %376 }
 0x10c   : > { %v382_v16 = vsel %vm378_vm1, %v375_v12, %v377_v15  ;;  %v398_v17 = vsel %vm390_vm2, %v377_v15, 0  ;;  %v369_v18 = vpop.permute.xlu1 %368 }
 0x10d   : > { %1476 = vmatprep.subr.msk.bf16.mxu0 %vm390_vm2, %v382_v16  ;;  %1540 = vmatpush3.bf16.msra.mxu1 %v398_v17  ;;  %v1494_v16 = vld [vmem:[%s1954_s4 + $0x14] sm:$0xf] }
 0x10e   : > { %413 = vmatpush1.bf16.msra.mxu0 %v392_v19  ;;  %1541 = vmatprep.subr.bf16.mxu1 %v1643_v39 }
 0x10f   : > { %v371_v20 = vpop.permute.xlu0 %370 }
 0x110   : > { %v380_v21 = vsel %vm378_vm1, %v369_v18, %v371_v20  ;;  %v367_v22 = vpop.permute.xlu1 %366 }
 0x111   : > { %414 = vmatprep.subr.bf16.mxu0 %v380_v21  ;;  %1542 = vmatpush3.bf16.msra.mxu1 %v371_v20  ;;  %v379_v24 = vsel %vm378_vm1, %v367_v22, %v369_v18 }
 0x112   : > { %1547 = vmatprep.subr.bf16.mxu1 %v1643_v39  ;;  %415 = vmatpush1.bf16.msra.mxu0 %v379_v24 }
 0x113   : > { %v583_v25 = vpop.permute.xlu0 %582  ;;  %1479 = vmatprep.subr.msk.bf16.mxu0 %vm390_vm2, %v1729_v56 }
 0x114   : > { %1544 = vmatmul.mubr.msk.bf16.vlgmr.msra.gmra.mxu1 %vm386_vm3, %v1475_v23  ;;  %v585_v27 = vpop.permute.xlu1 %584 }
 0x115   : > { %1548 = vmatpush3.bf16.msra.mxu1 %v491_v26  ;;  %1551 = vmatprep.mubr.msk.bf16.mxu1 %vm1645_vm0, %v1643_v39  ;;  %v591_v32 = vsel %vm588_vm4, %v583_v25, %v585_v27 }
 0x116   : > { %1477 = vmatmul.mubr.msk.bf16.vlgmr.msra.gmra.mxu0 %vm386_vm3, %v1475_v23  ;;  %1549 = vmatprep.subr.bf16.mxu1 %v1643_v39  ;;  %v600_v37 = vsel %vm390_vm2, %v591_v32, 0 }
 0x117   : > { %506 = vmatpush1.bf16.msra.mxu0 %v485_v28  ;;  %v587_v29 = vpop.permute.xlu0 %586  ;;  %525 = vmatprep.mubr.bf16.mxu0 %v1642_v2 }
 0x118   : > { %507 = vmatprep.subr.bf16.mxu0 %v1737_v8  ;;  %v579_v30 = vpop.permute.xlu1 %578  ;;  %v592_v33 = vsel %vm588_vm4, %v585_v27, %v587_v29  ;;  %v606_v35 = vsel %vm390_vm2, %v587_v29, 0  ;;  %v1498_v29 = vld [vmem:[%s1954_s4 + $0x18] sm:$0xf] }
 0x119   : > { %1550 = vmatpush3.bf16.msra.mxu1 %v1740_v9 }
 0x11a   : > { %1555 = vmatprep.subr.bf16.mxu1 %v1643_v39 }
 0x11b   : > { %508 = vmatpush1.bf16.msra.mxu0 %v1743_v10  ;;  %v581_v34 = vpop.permute.xlu0 %580 }
 0x11c   : > { %1483 = vmatprep.subr.msk.bf16.mxu0 %vm390_vm2, %v592_v33  ;;  %1552 = vmatmul.mubr.msk.bf16.vlgmr.msra.gmra.mxu1 %vm386_vm3, %v357_v31  ;;  %v577_v36 = vpop.permute.xlu1 %576  ;;  %v590_v40 = vsel %vm588_vm4, %v579_v30, %v581_v34 }
 0x11d   : > { %1556 = vmatpush3.bf16.msra.mxu1 %v606_v35  ;;  %1559 = vmatprep.mubr.msk.bf16.mxu1 %vm1645_vm0, %v1643_v39  ;;  %v589_v43 = vsel %vm588_vm4, %v577_v36, %v579_v30 }
 0x11e   : > { %1480 = vmatmul.mubr.msk.bf16.vlgmr.msra.gmra.mxu0 %vm386_vm3, %v357_v31  ;;  %1557 = vmatprep.subr.bf16.mxu1 %v1643_v39 }
 0x11f   : > { %621 = vmatpush1.bf16.msra.mxu0 %v600_v37  ;;  %v701_v38 = vpop.permute.xlu0 %700  ;;  %640 = vmatprep.mubr.bf16.mxu0 %v1642_v2 }
 0x120   : > { %622 = vmatprep.subr.bf16.mxu0 %v590_v40  ;;  %v703_v41 = vpop.permute.xlu1 %702 }
 0x121   : > { %1558 = vmatpush3.bf16.msra.mxu1 %v581_v34  ;;  %v709_v44 = vsel %vm706_vm5, %v701_v38, %v703_v41 }
 0x122   : > { %1563 = vmatprep.subr.bf16.mxu1 %v1643_v39  ;;  %v718_v49 = vsel %vm390_vm2, %v709_v44, 0 }
 0x123   : > { %623 = vmatpush1.bf16.msra.mxu0 %v589_v43  ;;  %v705_v45 = vpop.permute.xlu0 %704  ;;  %v1502_v43 = vld [vmem:[%s1954_s4 + $0x1c] sm:$0xf] }
 0x124   : > { %v710_v46 = vsel %vm706_vm5, %v703_v41, %v705_v45  ;;  %v724_v47 = vsel %vm390_vm2, %v705_v45, 0  ;;  %1560 = vmatmul.mubr.msk.bf16.vlgmr.msra.gmra.mxu1 %vm386_vm3, %v1482_v42  ;;  %v697_v48 = vpop.permute.xlu1 %696 }
 0x125   : > { %1487 = vmatprep.subr.msk.bf16.mxu0 %vm390_vm2, %v710_v46  ;;  %1564 = vmatpush3.bf16.msra.mxu1 %v724_v47 }
 0x126   : > { %1484 = vmatmul.mubr.msk.bf16.vlgmr.msra.gmra.mxu0 %vm386_vm3, %v1482_v42  ;;  %1565 = vmatprep.subr.bf16.mxu1 %v1643_v39 }
 0x127   : > { %739 = vmatpush1.bf16.msra.mxu0 %v718_v49  ;;  %v699_v50 = vpop.permute.xlu0 %698  ;;  %758 = vmatprep.mubr.bf16.mxu0 %v1642_v2 }
 0x128   : > { %v708_v51 = vsel %vm706_vm5, %v697_v48, %v699_v50  ;;  %1567 = vmatprep.mubr.msk.bf16.mxu1 %vm1645_vm0, %v1643_v39  ;;  %v695_v52 = vpop.permute.xlu1 %694 }
 0x129   : > { %740 = vmatprep.subr.bf16.mxu0 %v708_v51  ;;  %1566 = vmatpush3.bf16.msra.mxu1 %v699_v50  ;;  %v707_v54 = vsel %vm706_vm5, %v695_v52, %v697_v48 }
 0x12a   : > { %1571 = vmatprep.subr.bf16.mxu1 %v1643_v39 }
 0x12b   : > { %741 = vmatpush1.bf16.msra.mxu0 %v707_v54  ;;  %v819_v55 = vpop.permute.xlu0 %818 }
 0x12c   : > { %1568 = vmatmul.mubr.msk.bf16.vlgmr.msra.gmra.mxu1 %vm386_vm3, %v1486_v53  ;;  %v821_v56 = vpop.permute.xlu1 %820 }
 0x12d   : > { %1575 = vmatprep.mubr.msk.bf16.mxu1 %vm1645_vm0, %v1643_v39  ;;  %v827_v57 = vsel %vm824_vm6, %v819_v55, %v821_v56 }
 0x12e   : > { %1488 = vmatmul.mubr.msk.bf16.vlgmr.msra.gmra.mxu0 %vm386_vm3, %v1486_v53  ;;  %v836_v61 = vsel %vm390_vm2, %v827_v57, 0 }
 0x12f   : > { %v823_v58 = vpop.permute.xlu0 %822  ;;  %876 = vmatprep.mubr.bf16.mxu0 %v1642_v2 }
 0x130   : > { %v828_v59 = vsel %vm824_vm6, %v821_v56, %v823_v58  ;;  %v842_v60 = vsel %vm390_vm2, %v823_v58, 0  ;;  %v815_v62 = vpop.permute.xlu1 %814 }
 0x131   : > { %1491 = vmatprep.subr.msk.bf16.mxu0 %vm390_vm2, %v828_v59  ;;  %1572 = vmatpush3.bf16.msra.mxu1 %v842_v60 }
 0x132   : > { %857 = vmatpush1.bf16.msra.mxu0 %v836_v61  ;;  %1573 = vmatprep.subr.bf16.mxu1 %v1643_v39 }
 0x133   : > { %v817_v63 = vpop.permute.xlu0 %816 }
 0x134   : > { %v826_v0 = vsel %vm824_vm6, %v815_v62, %v817_v63  ;;  %v813_v1 = vpop.permute.xlu1 %812 }
 0x135   : > { %858 = vmatprep.subr.bf16.mxu0 %v826_v0  ;;  %1574 = vmatpush3.bf16.msra.mxu1 %v817_v63  ;;  %v825_v4 = vsel %vm824_vm6, %v813_v1, %v815_v62 }
 0x136   : > { %1579 = vmatprep.subr.bf16.mxu1 %v1643_v39  ;;  %859 = vmatpush1.bf16.msra.mxu0 %v825_v4 }
 0x137   : > { %v937_v5 = vpop.permute.xlu0 %936 }
 0x138   : > { %1576 = vmatmul.mubr.msk.bf16.vlgmr.msra.gmra.mxu1 %vm386_vm3, %v1490_v3  ;;  %v939_v6 = vpop.permute.xlu1 %938 }
 0x139   : > { %1583 = vmatprep.mubr.msk.bf16.mxu1 %vm1645_vm0, %v1643_v39  ;;  %v945_v7 = vsel %vm942_vm7, %v937_v5, %v939_v6  ;;  %1492 = vmatmul.mubr.msk.bf16.vlgmr.msra.gmra.mxu0 %vm386_vm3, %v1490_v3 }
 0x13a   : > { %994 = vmatprep.mubr.bf16.mxu0 %v1642_v2  ;;  %v954_v11 = vsel %vm390_vm2, %v945_v7, 0 }
 0x13b   : > { %v941_v8 = vpop.permute.xlu0 %940 }
 0x13c   : > { %v946_v9 = vsel %vm942_vm7, %v939_v6, %v941_v8  ;;  %v960_v10 = vsel %vm390_vm2, %v941_v8, 0  ;;  %v933_v12 = vpop.permute.xlu1 %932 }
 0x13d   : > { %1495 = vmatprep.subr.msk.bf16.mxu0 %vm390_vm2, %v946_v9  ;;  %1580 = vmatpush3.bf16.msra.mxu1 %v960_v10 }
 0x13e   : > { %975 = vmatpush1.bf16.msra.mxu0 %v954_v11  ;;  %1581 = vmatprep.subr.bf16.mxu1 %v1643_v39 }
 0x13f   : > { %v935_v13 = vpop.permute.xlu0 %934 }
 0x140   : > { %v944_v14 = vsel %vm942_vm7, %v933_v12, %v935_v13  ;;  %v931_v15 = vpop.permute.xlu1 %930 }
 0x141   : > { %976 = vmatprep.subr.bf16.mxu0 %v944_v14  ;;  %1582 = vmatpush3.bf16.msra.mxu1 %v935_v13  ;;  %v943_v17 = vsel %vm942_vm7, %v931_v15, %v933_v12 }
 0x142   : > { %1587 = vmatprep.subr.bf16.mxu1 %v1643_v39  ;;  %977 = vmatpush1.bf16.msra.mxu0 %v943_v17 }
 0x143   : > { %v1055_v18 = vpop.permute.xlu0 %1054 }
 0x144   : > { %1584 = vmatmul.mubr.msk.bf16.vlgmr.msra.gmra.mxu1 %vm386_vm3, %v1494_v16  ;;  %v1057_v19 = vpop.permute.xlu1 %1056 }
 0x145   : > { %1591 = vmatprep.mubr.msk.bf16.mxu1 %vm1645_vm0, %v1643_v39  ;;  %v1063_v20 = vsel %vm1060_vm8, %v1055_v18, %v1057_v19  ;;  %1496 = vmatmul.mubr.msk.bf16.vlgmr.msra.gmra.mxu0 %vm386_vm3, %v1494_v16 }
 0x146   : > { %1112 = vmatprep.mubr.bf16.mxu0 %v1642_v2  ;;  %v1072_v24 = vsel %vm390_vm2, %v1063_v20, 0 }
 0x147   : > { %v1059_v21 = vpop.permute.xlu0 %1058 }
 0x148   : > { %v1064_v22 = vsel %vm1060_vm8, %v1057_v19, %v1059_v21  ;;  %v1078_v23 = vsel %vm390_vm2, %v1059_v21, 0  ;;  %v1051_v25 = vpop.permute.xlu1 %1050 }
 0x149   : > { %1499 = vmatprep.subr.msk.bf16.mxu0 %vm390_vm2, %v1064_v22  ;;  %1588 = vmatpush3.bf16.msra.mxu1 %v1078_v23 }
 0x14a   : > { %1093 = vmatpush1.bf16.msra.mxu0 %v1072_v24  ;;  %1589 = vmatprep.subr.bf16.mxu1 %v1643_v39 }
 0x14b   : > { %v1053_v26 = vpop.permute.xlu0 %1052 }
 0x14c   : > { %v1062_v27 = vsel %vm1060_vm8, %v1051_v25, %v1053_v26  ;;  %v1049_v28 = vpop.permute.xlu1 %1048 }
 0x14d   : > { %1094 = vmatprep.subr.bf16.mxu0 %v1062_v27  ;;  %1590 = vmatpush3.bf16.msra.mxu1 %v1053_v26  ;;  %v1061_v30 = vsel %vm1060_vm8, %v1049_v28, %v1051_v25 }
 0x14e   : > { %1595 = vmatprep.subr.bf16.mxu1 %v1643_v39  ;;  %1095 = vmatpush1.bf16.msra.mxu0 %v1061_v30 }
 0x14f   : > { %v1173_v31 = vpop.permute.xlu0 %1172 }
 0x150   : > { %1592 = vmatmul.mubr.msk.bf16.vlgmr.msra.gmra.mxu1 %vm386_vm3, %v1498_v29  ;;  %v1175_v32 = vpop.permute.xlu1 %1174 }
 0x151   : > { %1599 = vmatprep.mubr.msk.bf16.mxu1 %vm1645_vm0, %v1643_v39  ;;  %v1181_v33 = vsel %vm1178_vm9, %v1173_v31, %v1175_v32  ;;  %1500 = vmatmul.mubr.msk.bf16.vlgmr.msra.gmra.mxu0 %vm386_vm3, %v1498_v29 }
 0x152   : > { %1230 = vmatprep.mubr.bf16.mxu0 %v1642_v2  ;;  %v1190_v37 = vsel %vm390_vm2, %v1181_v33, 0 }
 0x153   : > { %v1177_v34 = vpop.permute.xlu0 %1176 }
 0x154   : > { %v1182_v35 = vsel %vm1178_vm9, %v1175_v32, %v1177_v34  ;;  %v1196_v36 = vsel %vm390_vm2, %v1177_v34, 0  ;;  %v1169_v38 = vpop.permute.xlu1 %1168 }
 0x155   : > { %1503 = vmatprep.subr.msk.bf16.mxu0 %vm390_vm2, %v1182_v35  ;;  %1596 = vmatpush3.bf16.msra.mxu1 %v1196_v36 }
 0x156   : > { %1211 = vmatpush1.bf16.msra.mxu0 %v1190_v37  ;;  %1597 = vmatprep.subr.bf16.mxu1 %v1643_v39 }
 0x157   : > { %v1171_v40 = vpop.permute.xlu0 %1170 }
 0x158   : > { %v1180_v41 = vsel %vm1178_vm9, %v1169_v38, %v1171_v40  ;;  %v1167_v42 = vpop.permute.xlu1 %1166 }
 0x159   : > { %1212 = vmatprep.subr.bf16.mxu0 %v1180_v41  ;;  %1598 = vmatpush3.bf16.msra.mxu1 %v1171_v40  ;;  %v1179_v44 = vsel %vm1178_vm9, %v1167_v42, %v1169_v38 }
 0x15a   : > { %1603 = vmatprep.subr.bf16.mxu1 %v1643_v39  ;;  %1213 = vmatpush1.bf16.msra.mxu0 %v1179_v44 }
 0x15b   : > { %v1291_v45 = vpop.permute.xlu0 %1290 }
 0x15c   : > { %1600 = vmatmul.mubr.msk.bf16.vlgmr.msra.gmra.mxu1 %vm386_vm3, %v1502_v43  ;;  %v1293_v46 = vpop.permute.xlu1 %1292 }
 0x15d   : > { %1607 = vmatprep.mubr.msk.bf16.mxu1 %vm1645_vm0, %v1643_v39  ;;  %v1299_v47 = vsel %vm1296_vm10, %v1291_v45, %v1293_v46  ;;  %1504 = vmatmul.mubr.msk.bf16.vlgmr.msra.gmra.mxu0 %vm386_vm3, %v1502_v43 }
 0x15e   : > { %1348 = vmatprep.mubr.bf16.mxu0 %v1642_v2  ;;  %v1308_v51 = vsel %vm390_vm2, %v1299_v47, 0  ;;  %v1506_v2 = vld [vmem:[%s1954_s4 + $0x20] sm:$0xf] }
 0x15f   : > { %v1295_v48 = vpop.permute.xlu0 %1294 }
 0x160   : > { %v1300_v49 = vsel %vm1296_vm10, %v1293_v46, %v1295_v48  ;;  %v1314_v50 = vsel %vm390_vm2, %v1295_v48, 0  ;;  %v1287_v52 = vpop.permute.xlu1 %1286 }
 0x161   : > { %1507 = vmatprep.subr.msk.bf16.mxu0 %vm390_vm2, %v1300_v49  ;;  %1604 = vmatpush3.bf16.msra.mxu1 %v1314_v50 }
 0x162   : > { %1329 = vmatpush1.bf16.msra.mxu0 %v1308_v51  ;;  %1605 = vmatprep.subr.bf16.mxu1 %v1643_v39 }
 0x163   : > { %v1289_v53 = vpop.permute.xlu0 %1288 }
 0x164   : > { %v1298_v54 = vsel %vm1296_vm10, %v1287_v52, %v1289_v53  ;;  %v1285_v55 = vpop.permute.xlu1 %1284 }
 0x165   : > { %1330 = vmatprep.subr.bf16.mxu0 %v1298_v54  ;;  %1606 = vmatpush3.bf16.msra.mxu1 %v1289_v53  ;;  %v1297_v56 = vsel %vm1296_vm10, %v1285_v55, %v1287_v52 }
 0x166   : > { %1331 = vmatpush1.bf16.msra.mxu0 %v1297_v56 }
 0x168   : > { %1608 = vmatmul.mubr.msk.bf16.vlgmr.msra.gmra.mxu1 %vm386_vm3, %v1506_v2 }
 0x169   : > { %1508 = vmatmul.mubr.msk.bf16.vlgmr.msra.gmra.mxu0 %vm386_vm3, %v1506_v2 }
 0x1d4   : > { %v475_v57 = vpop.f32.mrf.mxu1 }
 0x1d6   : > { %v434_v58 = vpop.f32.mrf.mxu0  ;;  %v1545_v39 = vpop.f32.mrf.mxu1 }
 0x1d8   : > { %v436_v59 = vpop.f32.mrf.mxu0  ;;  %v478_v60 = vpop.f32.mrf.mxu1 }
 0x1da   : > { %v438_v61 = vpop.f32.mrf.mxu0  ;;  %v1546_v62 = vpop.f32.mrf.mxu1 }
 0x1dc   : > { %v439_v63 = vpop.f32.mrf.mxu0  ;;  %v568_v0 = vpop.f32.mrf.mxu1 }
 0x1dd   : > { %v569_v49 = vadd.f32 %v568_v0, %v475_v57 }
 0x1de   : > { %v527_v1 = vpop.f32.mrf.mxu0  ;;  %v1553_v3 = vpop.f32.mrf.mxu1 }
 0x1df   : > { %v528_v51 = vadd.f32 %v527_v1, %v434_v58 }
 0x1e0   : > { %v529_v4 = vpop.f32.mrf.mxu0  ;;  %v571_v5 = vpop.f32.mrf.mxu1 }
 0x1e1   : > { %v530_v54 = vadd.f32 %v529_v4, %v436_v59 }
 0x1e2   : > { %v531_v6 = vpop.f32.mrf.mxu0  ;;  %v1554_v7 = vpop.f32.mrf.mxu1 }
 0x1e4   : > { %v532_v8 = vpop.f32.mrf.mxu0  ;;  %v683_v9 = vpop.f32.mrf.mxu1 }
 0x1e5   : > { %v691_v52 = vadd.f32 %v683_v9, %v569_v49 }
 0x1e6   : > { %v642_v10 = vpop.f32.mrf.mxu0  ;;  %v1561_v11 = vpop.f32.mrf.mxu1 }
 0x1e7   : > { %v689_v55 = vadd.f32 %v642_v10, %v528_v51 }
 0x1e8   : > { %v644_v12 = vpop.f32.mrf.mxu0  ;;  %v686_v13 = vpop.f32.mrf.mxu1 }
 0x1e9   : > { %v690_v62 = vadd.f32 %v644_v12, %v530_v54  ;;  %v1404_v13 = vpop.permute.xlu0 %1403 }
 0x1ea   : > { %v646_v14 = vpop.f32.mrf.mxu0  ;;  %v1562_v15 = vpop.f32.mrf.mxu1 }
 0x1ec   : > { %v647_v16 = vpop.f32.mrf.mxu0  ;;  %v801_v17 = vpop.f32.mrf.mxu1 }
 0x1ed   : > { %v809_v39 = vadd.f32 %v801_v17, %v691_v52 }
 0x1ee   : > { %v760_v18 = vpop.f32.mrf.mxu0  ;;  %v1569_v19 = vpop.f32.mrf.mxu1 }
 0x1ef   : > { %v807_v63 = vadd.f32 %v760_v18, %v689_v55 }
 0x1f0   : > { %v762_v20 = vpop.f32.mrf.mxu0  ;;  %v804_v21 = vpop.f32.mrf.mxu1 }
 0x1f1   : > { %v808_v7 = vadd.f32 %v762_v20, %v690_v62 }
 0x1f2   : > { %v764_v22 = vpop.f32.mrf.mxu0  ;;  %v1570_v23 = vpop.f32.mrf.mxu1 }
 0x1f4   : > { %v765_v24 = vpop.f32.mrf.mxu0 }
 0x1f8   : > { %v919_v25 = vpop.f32.mrf.mxu1 }
 0x1f9   : > { %v878_v26 = vpop.f32.mrf.mxu0  ;;  %v927_v3 = vadd.f32 %v919_v25, %v809_v39 }
 0x1fa   : > { %v1577_v27 = vpop.f32.mrf.mxu1  ;;  %v925_v8 = vadd.f32 %v878_v26, %v807_v63 }
 0x1fb   : > { %v880_v28 = vpop.f32.mrf.mxu0 }
 0x1fc   : > { %v922_v29 = vpop.f32.mrf.mxu1  ;;  %v926_v58 = vadd.f32 %v880_v28, %v808_v7 }
 0x1fd   : > { %v882_v30 = vpop.f32.mrf.mxu0 }
 0x1fe   : > { %v1578_v31 = vpop.f32.mrf.mxu1 }
 0x1ff   : > { %v883_v32 = vpop.f32.mrf.mxu0 }
 0x204   : > { %v1037_v33 = vpop.f32.mrf.mxu1 }
 0x205   : > { %v996_v34 = vpop.f32.mrf.mxu0  ;;  %v1045_v57 = vadd.f32 %v1037_v33, %v927_v3 }
 0x206   : > { %v1585_v35 = vpop.f32.mrf.mxu1  ;;  %v1043_v1 = vadd.f32 %v996_v34, %v925_v8 }
 0x207   : > { %v998_v36 = vpop.f32.mrf.mxu0 }
 0x208   : > { %v1040_v37 = vpop.f32.mrf.mxu1  ;;  %v1044_v59 = vadd.f32 %v998_v36, %v926_v58 }
 0x209   : > { %v1000_v38 = vpop.f32.mrf.mxu0 }
 0x20a   : > { %v1586_v40 = vpop.f32.mrf.mxu1 }
 0x20b   : > { %v1001_v41 = vpop.f32.mrf.mxu0 }
 0x210   : > { %v1155_v42 = vpop.f32.mrf.mxu1 }
 0x211   : > { %v1114_v43 = vpop.f32.mrf.mxu0  ;;  %v1163_v9 = vadd.f32 %v1155_v42, %v1045_v57 }
 0x212   : > { %v1593_v44 = vpop.f32.mrf.mxu1  ;;  %v1161_v4 = vadd.f32 %v1114_v43, %v1043_v1 }
 0x213   : > { %v1116_v45 = vpop.f32.mrf.mxu0 }
 0x214   : > { %v1158_v46 = vpop.f32.mrf.mxu1  ;;  %v1162_v14 = vadd.f32 %v1116_v45, %v1044_v59 }
 0x215   : > { %v1118_v47 = vpop.f32.mrf.mxu0 }
 0x216   : > { %v1594_v48 = vpop.f32.mrf.mxu1 }
 0x217   : > { %v1119_v50 = vpop.f32.mrf.mxu0 }
 0x21c   : > { %v1273_v53 = vpop.f32.mrf.mxu1 }
 0x21d   : > { %v1232_v2 = vpop.f32.mrf.mxu0  ;;  %v1281_v10 = vadd.f32 %v1273_v53, %v1163_v9 }
 0x21e   : > { %v1601_v56 = vpop.f32.mrf.mxu1  ;;  %v1279_v15 = vadd.f32 %v1232_v2, %v1161_v4 }
 0x21f   : > { %v1234_v60 = vpop.f32.mrf.mxu0 }
 0x220   : > { %v1276_v61 = vpop.f32.mrf.mxu1  ;;  %v1280_v18 = vadd.f32 %v1234_v60, %v1162_v14 }
 0x221   : > { %v1236_v5 = vpop.f32.mrf.mxu0 }
 0x222   : > { %v1602_v6 = vpop.f32.mrf.mxu1 }
 0x223   : > { %v1237_v0 = vpop.f32.mrf.mxu0 }
 0x228   : > { %v1391_v11 = vpop.f32.mrf.mxu1 }
 0x229   : > { %v1399_v12 = vadd.f32 %v1391_v11, %v1281_v10  ;;  %v1350_v16 = vpop.f32.mrf.mxu0 }
 0x22a   : > { %v1609_v17 = vpop.f32.mrf.mxu1  ;;  %v1397_v20 = vadd.f32 %v1350_v16, %v1279_v15 }
 0x22b   : > { %v1408_v19 = vadd.f32 %v1404_v13, %v1399_v12  ;;  %v1352_v21 = vpop.f32.mrf.mxu0 }
 0x22c   : > { %v1394_v22 = vpop.f32.mrf.mxu1  ;;  %v1406_v23 = vadd.f32 %v1404_v13, %v1397_v20  ;;  %v1398_v24 = vadd.f32 %v1352_v21, %v1280_v18 }
 0x22d   : > { %1412 = vst.msk [vmem:[%s251_s28 + $0x10] sm:$0xff] %vm1411_vm11, %v1408_v19  ;;  %v1354_v25 = vpop.f32.mrf.mxu0 }
 0x22e   : > { %v1610_v26 = vpop.f32.mrf.mxu1  ;;  %1409 = vst [vmem:[%s251_s28] sm:$0xff] %v1406_v23  ;;  %v1407_v27 = vadd.f32 %v1404_v13, %v1398_v24 }
 0x22f   : > { %v1355_v28 = vpop.f32.mrf.mxu0 }
 0x230   : > { %1410 = vst [vmem:[%s251_s28 + $0x8] sm:$0xff] %v1407_v27 }
 0x231 PF: > { %s16_s21 = sadd.s32 1, %s1640_s21  }
 0x232   : > { %p13_p4 = scmp.ge.s32.totalorder %s16_s21, 4  }
 0x234   :  { %15 = sbr.rel (!%p13_p4) target bundleno = 1 (0x1), region = 82 }

</bundles_post_ra>
